<compile_context>
chip_gen: v7x
topology: tpu7x:2x2x1
jax: 0.10.0
libtpu: 0.0.40
codegen_flags: <defaults>
</compile_context>

<pallas_src>
import functools

import jax
import jax.numpy as jnp
from jax import lax
from jax.experimental import pallas as pl
from jax.experimental.pallas import tpu as pltpu

BLOCK_CHANNELS = (64, 128, 256, 512)
LN_EPS = 1e-5


def _ln_act(h, gamma, beta, *, relu=True):
    """LayerNorm (+ optional ReLU).

    Statistics are computed in f32 in a single pass (sum / sumsq), breaking the
    mean->var dependency.  The normalize/affine/ReLU chain runs in gamma.dtype
    (bf16 on the bf16 path), which is what the next MXU matmul consumes.
    """
    c = h.shape[-1]
    hf = h.astype(jnp.float32)
    s = jnp.sum(hf, axis=-1, keepdims=True)
    sq = jnp.sum(hf * hf, axis=-1, keepdims=True)
    mean = s * (1.0 / c)
    var = jnp.maximum(sq * (1.0 / c) - mean * mean, 0.0)
    inv = lax.rsqrt(var + LN_EPS)
    dt = gamma.dtype
    y = (h.astype(dt) - mean.astype(dt)) * inv.astype(dt) * gamma + beta
    if relu:
        y = jnp.maximum(y, 0)
    return y


def pointnet_mlp_kernel(x_ref,
                        w1, b1, g1, be1,
                        w2, b2, g2, be2,
                        w3, b3, g3, be3,
                        w4, b4, g4, be4,
                        o_ref,
                        *, tiles_per_split, n_valid, need_mask):
    """Per-point MLP (4x Linear+LN+ReLU) + running max-pool over point tiles.

    Grid = (split, B, tiles_per_split).  The (1,1,1,512) output block is
    resident across the trailing tile axis and acts as the max accumulator.
    """
    s = pl.program_id(0)
    t = pl.program_id(2)

    x = x_ref[0]                              # (rows_tile, C_in), f32
    rows, c_in = x.shape

    # ---- Layer 1: K = C_in is tiny -> VPU broadcast FMAs, skip the MXU. ----
    w1v = w1[...]                             # (C_in, 64), f32
    if c_in <= 4:
        h = x[:, 0:1] * w1v[0:1, :]
        for c in range(1, c_in):
            h = h + x[:, c:c + 1] * w1v[c:c + 1, :]
    else:
        # For larger C_in (normals/colors) a single K-padded matmul is cheaper.
        h = jnp.dot(x.astype(w1v.dtype), w1v, preferred_element_type=jnp.float32)
    h = h + b1[...]
    h = _ln_act(h, g1[...], be1[...])         # bf16 out on the bf16 path

    # ---- Layers 2-4: bf16 operands on the MXU, f32 accumulate, f32 stats,
    #      bf16 normalize/affine/ReLU (the next layer's matmul operand). ----
    for (w, b, g, be) in ((w2, b2, g2, be2),
                          (w3, b3, g3, be3),
                          (w4, b4, g4, be4)):
        h = jnp.dot(h, w[...], preferred_element_type=jnp.float32) + b[...]
        h = _ln_act(h, g[...], be[...])

    # ---- torch.max(x, 1)[0]: mask padded rows, max over tile, fold in. ----
    if need_mask:
        row0 = (s * tiles_per_split + t) * rows
        iota = lax.broadcasted_iota(jnp.int32, (rows, 1), 0)
        h = jnp.where(row0 + iota < n_valid, h, jnp.asarray(-jnp.inf, h.dtype))

    tile_max = jnp.max(h, axis=0, keepdims=True).astype(jnp.float32)   # (1, 512)
    tile_max = tile_max.reshape(1, 1, 1, tile_max.shape[-1])

    @pl.when(t == 0)
    def _():
        # Must be -inf (not 0): ReLU can legitimately output exact zeros.
        o_ref[...] = jnp.full(o_ref.shape, -jnp.inf, o_ref.dtype)

    o_ref[...] = jnp.maximum(o_ref[...], tile_max)


def _plan_tiles(n, max_tile=2048):
    """Split N points into near-equal tiles of <= max_tile rows, each a
    multiple of 8 rows.  Returns (rows_tile, num_tiles, padded_n)."""
    num_tiles = -(-n // max_tile)
    rows = -(-n // num_tiles)
    rows = -(-rows // 8) * 8
    return rows, num_tiles, rows * num_tiles


def prepare_params(flat, use_bf16):
    """Cast MXU weights (layers 2-4) and LN gamma/beta (layers 1-4) to bf16;
    biases and the final-projection params stay f32."""
    p = list(flat)
    if use_bf16:
        for layer in range(4):
            base = 4 * layer
            if layer > 0:
                p[base] = p[base].astype(jnp.bfloat16)        # weight
            p[base + 2] = p[base + 2].astype(jnp.bfloat16)    # LN gamma
            p[base + 3] = p[base + 3].astype(jnp.bfloat16)    # LN beta
    return p


def _final_projection(pooled, wf, bf, gf, bef, *, use_bf16):
    """Batched (B, 512) @ (512, 768) + LayerNorm, done in plain XLA (M is tiny)."""
    if use_bf16:
        y = jnp.dot(pooled.astype(jnp.bfloat16), wf.astype(jnp.bfloat16),
                    preferred_element_type=jnp.float32)
    else:
        y = jnp.dot(pooled, wf, preferred_element_type=jnp.float32)
    return _ln_act(y + bf, gf, bef, relu=False)


def pointnet_encoder(x, flat_params, *, use_bf16=True, max_tile=2048):
    """Pallas per-point MLP + max-pool, then batched final projection in XLA."""
    B, N, c_in = x.shape
    params = prepare_params(flat_params, use_bf16)
    mlp_params = params[:16]
    wf, bf, gf, bef = params[16:20]
    c_last = BLOCK_CHANNELS[-1]

    rows_tile, num_tiles, padded_n = _plan_tiles(N, max_tile)
    need_mask = padded_n != N
    if need_mask:
        x = jnp.pad(x, ((0, 0), (0, padded_n - N), (0, 0)))

    # Keep both v7x TensorCores busy when B == 1 by splitting the tile axis.
    split = 2 if (B == 1 and num_tiles >= 2 and num_tiles % 2 == 0) else 1
    tps = num_tiles // split

    kernel = functools.partial(pointnet_mlp_kernel,
                               tiles_per_split=tps, n_valid=N,
                               need_mask=need_mask)

    in_specs = [pl.BlockSpec((1, rows_tile, c_in),
                             lambda s, b, t, _tps=tps: (b, s * _tps + t, 0))]
    in_specs += [pl.BlockSpec(p.shape, lambda s, b, t: (0, 0))
                 for p in mlp_params]

    flops = 2 * B * padded_n * sum(ci * co for ci, co in
                                   zip((c_in,) + BLOCK_CHANNELS[:-1],
                                       BLOCK_CHANNELS))
    bytes_accessed = (B * padded_n * c_in * 4
                      + sum(int(p.size) * p.dtype.itemsize for p in mlp_params)
                      + split * B * c_last * 4)
    cost = pl.CostEstimate(flops=int(flops),
                           transcendentals=int(B * padded_n * len(BLOCK_CHANNELS)),
                           bytes_accessed=int(bytes_accessed))

    # vmem limit sized from the row tile (keeps headroom on v7x's 64 MiB VMEM).
    vmem_limit = (48 if rows_tile > 1024 else 32) * 1024 * 1024

    out = pl.pallas_call(
        kernel,
        out_shape=jax.ShapeDtypeStruct((split, B, 1, c_last), jnp.float32),
        grid=(split, B, tps),
        in_specs=in_specs,
        out_specs=pl.BlockSpec((1, 1, 1, c_last), lambda s, b, t: (s, b, 0, 0)),
        compiler_params=pltpu.CompilerParams(
            dimension_semantics=("parallel", "parallel", "arbitrary"),
            vmem_limit_bytes=vmem_limit),
        cost_estimate=cost,
    )(x, *mlp_params)

    pooled = jnp.max(out, axis=0)[:, 0, :]          # (B, 512)
    return _final_projection(pooled, wf, bf, gf, bef, use_bf16=use_bf16)


def init_params(key, in_channels=3, output_channels=768):
    """Deterministic synthetic init (PyTorch-like uniform for Linear,
    ones/zeros for LayerNorm).  Linear weights stored as (fan_in, fan_out)."""
    dims = (in_channels,) + BLOCK_CHANNELS
    flat = []
    for i in range(len(BLOCK_CHANNELS)):
        fan_in, fan_out = dims[i], dims[i + 1]
        key, kw, kb = jax.random.split(key, 3)
        bound = 1.0 / jnp.sqrt(fan_in)
        w = jax.random.uniform(kw, (fan_in, fan_out), jnp.float32, -bound, bound)
        b = jax.random.uniform(kb, (1, fan_out), jnp.float32, -bound, bound)
        flat += [w, b, jnp.ones((1, fan_out), jnp.float32),
                 jnp.zeros((1, fan_out), jnp.float32)]
    fan_in = BLOCK_CHANNELS[-1]
    key, kw, kb = jax.random.split(key, 3)
    bound = 1.0 / jnp.sqrt(fan_in)
    wf = jax.random.uniform(kw, (fan_in, output_channels), jnp.float32, -bound, bound)
    bf = jax.random.uniform(kb, (1, output_channels), jnp.float32, -bound, bound)
    flat += [wf, bf, jnp.ones((1, output_channels), jnp.float32),
             jnp.zeros((1, output_channels), jnp.float32)]
    return flat


def reference_forward(x, flat, use_bf16=True):
    """Pure-JAX reference mirroring the PyTorch forward.  With use_bf16=True it
    mirrors the kernel's bf16 matmul/elementwise recipe (self-consistency
    check); with use_bf16=False it is the faithful f32 PyTorch numerics.
    NOTE: the bf16 recipe deviates from f32 PyTorch by ~1e-2-level rel error."""
    p = prepare_params(flat, use_bf16)
    w1, b1, g1, be1 = p[0:4]
    h = jnp.einsum("bnc,cd->bnd", x, w1,
                   preferred_element_type=jnp.float32) + b1
    h = _ln_act(h, g1, be1)
    for i in (1, 2, 3):
        w, b, g, be = p[4 * i: 4 * i + 4]
        h = jnp.einsum("bnc,cd->bnd", h, w,
                       preferred_element_type=jnp.float32) + b
        h = _ln_act(h, g, be)
    pooled = jnp.max(h, axis=1).astype(jnp.float32)     # torch.max(x, 1)[0]
    wf, bf, gf, bef = p[16:20]
    return _final_projection(pooled, wf, bf, gf, bef, use_bf16=use_bf16)


if __name__ == "__main__":
    key = jax.random.PRNGKey(0)
    B, N, C_IN, OUT = 2, 16, 3, 768

    key, kx = jax.random.split(key)
    x = jax.random.normal(kx, (B, N, C_IN), jnp.float32)
    flat_params = init_params(key, in_channels=C_IN, output_channels=OUT)

    # 1) Faithful f32 path vs the f32 reference (true PyTorch numerics).
    run_f32 = jax.jit(functools.partial(pointnet_encoder, use_bf16=False))
    out_f32 = jax.block_until_ready(run_f32(x, flat_params))
    ref_f32 = reference_forward(x, flat_params, use_bf16=False)
    assert out_f32.shape == (B, OUT)
    assert jnp.allclose(out_f32, ref_f32, atol=2e-3, rtol=2e-3), "f32 mismatch"

    # 2) bf16 fast path vs the bf16-mirrored reference (self-consistency).
    run_bf16 = jax.jit(functools.partial(pointnet_encoder, use_bf16=True))
    out_bf16 = jax.block_until_ready(run_bf16(x, flat_params))
    ref_bf16 = reference_forward(x, flat_params, use_bf16=True)
    assert jnp.allclose(out_bf16, ref_bf16, atol=5e-2, rtol=5e-2), "bf16 mismatch"

    # 3) Awkward N (padding + masking) and B==1 (tile-axis core split).
    key, kx2 = jax.random.split(key)
    x2 = jax.random.normal(kx2, (1, 50, C_IN), jnp.float32)
    run_split = jax.jit(functools.partial(pointnet_encoder,
                                          use_bf16=False, max_tile=16))
    out2 = jax.block_until_ready(run_split(x2, flat_params))
    ref2 = reference_forward(x2, flat_params, use_bf16=False)
    assert out2.shape == (1, OUT)
    assert jnp.allclose(out2, ref2, atol=2e-3, rtol=2e-3), "masked/split mismatch"

    print("KERNEL_OK")
</pallas_src>

<mosaic_0001>
module attributes {stable_mosaic.version = 11 : i64} {
  func.func @pointnet_mlp_kernel(%arg0: i32, %arg1: i32, %arg2: i32, %arg3: memref<1x16x3xf32, #tpu.memory_space<vmem>>, %arg4: memref<3x64xf32, #tpu.memory_space<vmem>>, %arg5: memref<1x64xf32, #tpu.memory_space<vmem>>, %arg6: memref<1x64xf32, #tpu.memory_space<vmem>>, %arg7: memref<1x64xf32, #tpu.memory_space<vmem>>, %arg8: memref<64x128xf32, #tpu.memory_space<vmem>>, %arg9: memref<1x128xf32, #tpu.memory_space<vmem>>, %arg10: memref<1x128xf32, #tpu.memory_space<vmem>>, %arg11: memref<1x128xf32, #tpu.memory_space<vmem>>, %arg12: memref<128x256xf32, #tpu.memory_space<vmem>>, %arg13: memref<1x256xf32, #tpu.memory_space<vmem>>, %arg14: memref<1x256xf32, #tpu.memory_space<vmem>>, %arg15: memref<1x256xf32, #tpu.memory_space<vmem>>, %arg16: memref<256x512xf32, #tpu.memory_space<vmem>>, %arg17: memref<1x512xf32, #tpu.memory_space<vmem>>, %arg18: memref<1x512xf32, #tpu.memory_space<vmem>>, %arg19: memref<1x512xf32, #tpu.memory_space<vmem>>, %arg20: memref<1x1x1x512xf32, #tpu.memory_space<vmem>>) attributes {dimension_semantics = [#tpu.dimension_semantics<parallel>, #tpu.dimension_semantics<parallel>, #tpu.dimension_semantics<arbitrary>], iteration_bounds = array<i64: 1, 2, 1>, scalar_prefetch = 0 : i64, scratch_operands = 0 : i64, tpu.core_type = #tpu.core_type<tc>, window_params = [{transform_indices = @transform_0, window_bounds = array<i64: 1, 16, 3>}, {pipeline_mode = #tpu.pipeline_mode<synchronous>, transform_indices = @transform_1, window_bounds = array<i64: 3, 64>}, {pipeline_mode = #tpu.pipeline_mode<synchronous>, transform_indices = @transform_2, window_bounds = array<i64: 1, 64>}, {pipeline_mode = #tpu.pipeline_mode<synchronous>, transform_indices = @transform_3, window_bounds = array<i64: 1, 64>}, {pipeline_mode = #tpu.pipeline_mode<synchronous>, transform_indices = @transform_4, window_bounds = array<i64: 1, 64>}, {pipeline_mode = #tpu.pipeline_mode<synchronous>, transform_indices = @transform_5, window_bounds = array<i64: 64, 128>}, {pipeline_mode = #tpu.pipeline_mode<synchronous>, transform_indices = @transform_6, window_bounds = array<i64: 1, 128>}, {pipeline_mode = #tpu.pipeline_mode<synchronous>, transform_indices = @transform_7, window_bounds = array<i64: 1, 128>}, {pipeline_mode = #tpu.pipeline_mode<synchronous>, transform_indices = @transform_8, window_bounds = array<i64: 1, 128>}, {pipeline_mode = #tpu.pipeline_mode<synchronous>, transform_indices = @transform_9, window_bounds = array<i64: 128, 256>}, {pipeline_mode = #tpu.pipeline_mode<synchronous>, transform_indices = @transform_10, window_bounds = array<i64: 1, 256>}, {pipeline_mode = #tpu.pipeline_mode<synchronous>, transform_indices = @transform_11, window_bounds = array<i64: 1, 256>}, {pipeline_mode = #tpu.pipeline_mode<synchronous>, transform_indices = @transform_12, window_bounds = array<i64: 1, 256>}, {pipeline_mode = #tpu.pipeline_mode<synchronous>, transform_indices = @transform_13, window_bounds = array<i64: 256, 512>}, {pipeline_mode = #tpu.pipeline_mode<synchronous>, transform_indices = @transform_14, window_bounds = array<i64: 1, 512>}, {pipeline_mode = #tpu.pipeline_mode<synchronous>, transform_indices = @transform_15, window_bounds = array<i64: 1, 512>}, {pipeline_mode = #tpu.pipeline_mode<synchronous>, transform_indices = @transform_16, window_bounds = array<i64: 1, 512>}, {transform_indices = @transform_17, window_bounds = array<i64: 1, 1, 1, 512>}]} {
    %c0 = arith.constant 0 : index
    %c0_0 = arith.constant 0 : index
    %c0_1 = arith.constant 0 : index
    %0 = vector.load %arg3[%c0, %c0_0, %c0_1] : memref<1x16x3xf32, #tpu.memory_space<vmem>>, vector<1x16x3xf32>
    %1 = vector.shape_cast %0 : vector<1x16x3xf32> to vector<16x3xf32>
    %c0_2 = arith.constant 0 : index
    %c0_3 = arith.constant 0 : index
    %2 = vector.load %arg4[%c0_2, %c0_3] : memref<3x64xf32, #tpu.memory_space<vmem>>, vector<3x64xf32>
    %3 = vector.extract_strided_slice %1 {offsets = [0, 0], sizes = [16, 1], strides = [1, 1]} : vector<16x3xf32> to vector<16x1xf32>
    %4 = vector.extract_strided_slice %2 {offsets = [0, 0], sizes = [1, 64], strides = [1, 1]} : vector<3x64xf32> to vector<1x64xf32>
    %5 = vector.broadcast %3 : vector<16x1xf32> to vector<16x64xf32>
    %6 = vector.broadcast %4 : vector<1x64xf32> to vector<16x64xf32>
    %7 = arith.mulf %5, %6 : vector<16x64xf32>
    %8 = vector.extract_strided_slice %1 {offsets = [0, 1], sizes = [16, 1], strides = [1, 1]} : vector<16x3xf32> to vector<16x1xf32>
    %9 = vector.extract_strided_slice %2 {offsets = [1, 0], sizes = [1, 64], strides = [1, 1]} : vector<3x64xf32> to vector<1x64xf32>
    %10 = vector.broadcast %8 : vector<16x1xf32> to vector<16x64xf32>
    %11 = vector.broadcast %9 : vector<1x64xf32> to vector<16x64xf32>
    %12 = arith.mulf %10, %11 : vector<16x64xf32>
    %13 = arith.addf %7, %12 : vector<16x64xf32>
    %14 = vector.extract_strided_slice %1 {offsets = [0, 2], sizes = [16, 1], strides = [1, 1]} : vector<16x3xf32> to vector<16x1xf32>
    %15 = vector.extract_strided_slice %2 {offsets = [2, 0], sizes = [1, 64], strides = [1, 1]} : vector<3x64xf32> to vector<1x64xf32>
    %16 = vector.broadcast %14 : vector<16x1xf32> to vector<16x64xf32>
    %17 = vector.broadcast %15 : vector<1x64xf32> to vector<16x64xf32>
    %18 = arith.mulf %16, %17 : vector<16x64xf32>
    %19 = arith.addf %13, %18 : vector<16x64xf32>
    %c0_4 = arith.constant 0 : index
    %c0_5 = arith.constant 0 : index
    %20 = vector.load %arg5[%c0_4, %c0_5] : memref<1x64xf32, #tpu.memory_space<vmem>>, vector<1x64xf32>
    %21 = vector.broadcast %20 : vector<1x64xf32> to vector<16x64xf32>
    %22 = arith.addf %19, %21 : vector<16x64xf32>
    %c0_6 = arith.constant 0 : index
    %c0_7 = arith.constant 0 : index
    %23 = vector.load %arg6[%c0_6, %c0_7] : memref<1x64xf32, #tpu.memory_space<vmem>>, vector<1x64xf32>
    %c0_8 = arith.constant 0 : index
    %c0_9 = arith.constant 0 : index
    %24 = vector.load %arg7[%c0_8, %c0_9] : memref<1x64xf32, #tpu.memory_space<vmem>>, vector<1x64xf32>
    %cst = arith.constant dense<0.000000e+00> : vector<16xf32>
    %25 = vector.multi_reduction <add>, %22, %cst [1] : vector<16x64xf32> to vector<16xf32>
    %26 = vector.shape_cast %25 : vector<16xf32> to vector<16x1xf32>
    %27 = arith.mulf %22, %22 : vector<16x64xf32>
    %cst_10 = arith.constant dense<0.000000e+00> : vector<16xf32>
    %28 = vector.multi_reduction <add>, %27, %cst_10 [1] : vector<16x64xf32> to vector<16xf32>
    %29 = vector.shape_cast %28 : vector<16xf32> to vector<16x1xf32>
    %cst_11 = arith.constant 1.562500e-02 : f32
    %30 = vector.broadcast %cst_11 : f32 to vector<16x1xf32>
    %31 = arith.mulf %26, %30 : vector<16x1xf32>
    %cst_12 = arith.constant 1.562500e-02 : f32
    %32 = vector.broadcast %cst_12 : f32 to vector<16x1xf32>
    %33 = arith.mulf %29, %32 : vector<16x1xf32>
    %34 = arith.mulf %31, %31 : vector<16x1xf32>
    %35 = arith.subf %33, %34 : vector<16x1xf32>
    %cst_13 = arith.constant 0.000000e+00 : f32
    %36 = vector.broadcast %cst_13 : f32 to vector<16x1xf32>
    %37 = arith.maximumf %35, %36 : vector<16x1xf32>
    %cst_14 = arith.constant 9.99999974E-6 : f32
    %38 = vector.broadcast %cst_14 : f32 to vector<16x1xf32>
    %39 = arith.addf %37, %38 : vector<16x1xf32>
    %40 = math.rsqrt %39 : vector<16x1xf32>
    %41 = vector.broadcast %31 : vector<16x1xf32> to vector<16x64xf32>
    %42 = arith.subf %22, %41 : vector<16x64xf32>
    %43 = vector.broadcast %40 : vector<16x1xf32> to vector<16x64xf32>
    %44 = arith.mulf %42, %43 : vector<16x64xf32>
    %45 = vector.broadcast %23 : vector<1x64xf32> to vector<16x64xf32>
    %46 = arith.mulf %44, %45 : vector<16x64xf32>
    %47 = vector.broadcast %24 : vector<1x64xf32> to vector<16x64xf32>
    %48 = arith.addf %46, %47 : vector<16x64xf32>
    %cst_15 = arith.constant 0.000000e+00 : f32
    %49 = vector.broadcast %cst_15 : f32 to vector<16x64xf32>
    %50 = arith.maximumf %48, %49 : vector<16x64xf32>
    %c0_16 = arith.constant 0 : index
    %c0_17 = arith.constant 0 : index
    %51 = vector.load %arg8[%c0_16, %c0_17] : memref<64x128xf32, #tpu.memory_space<vmem>>, vector<64x128xf32>
    %cst_18 = arith.constant dense<0.000000e+00> : vector<16x128xf32>
    %52 = tpu.matmul %50, %51, %cst_18 {dimension_numbers = #tpu.dot_dimension_numbers<[1], [0], [0], [1], [0, 0, 1, 1], [], []>} : vector<16x64xf32>, vector<64x128xf32>, vector<16x128xf32> -> vector<16x128xf32>
    %c0_19 = arith.constant 0 : index
    %c0_20 = arith.constant 0 : index
    %53 = vector.load %arg9[%c0_19, %c0_20] : memref<1x128xf32, #tpu.memory_space<vmem>>, vector<1x128xf32>
    %54 = vector.broadcast %53 : vector<1x128xf32> to vector<16x128xf32>
    %55 = arith.addf %52, %54 : vector<16x128xf32>
    %c0_21 = arith.constant 0 : index
    %c0_22 = arith.constant 0 : index
    %56 = vector.load %arg10[%c0_21, %c0_22] : memref<1x128xf32, #tpu.memory_space<vmem>>, vector<1x128xf32>
    %c0_23 = arith.constant 0 : index
    %c0_24 = arith.constant 0 : index
    %57 = vector.load %arg11[%c0_23, %c0_24] : memref<1x128xf32, #tpu.memory_space<vmem>>, vector<1x128xf32>
    %cst_25 = arith.constant dense<0.000000e+00> : vector<16xf32>
    %58 = vector.multi_reduction <add>, %55, %cst_25 [1] : vector<16x128xf32> to vector<16xf32>
    %59 = vector.shape_cast %58 : vector<16xf32> to vector<16x1xf32>
    %60 = arith.mulf %55, %55 : vector<16x128xf32>
    %cst_26 = arith.constant dense<0.000000e+00> : vector<16xf32>
    %61 = vector.multi_reduction <add>, %60, %cst_26 [1] : vector<16x128xf32> to vector<16xf32>
    %62 = vector.shape_cast %61 : vector<16xf32> to vector<16x1xf32>
    %cst_27 = arith.constant 7.812500e-03 : f32
    %63 = vector.broadcast %cst_27 : f32 to vector<16x1xf32>
    %64 = arith.mulf %59, %63 : vector<16x1xf32>
    %cst_28 = arith.constant 7.812500e-03 : f32
    %65 = vector.broadcast %cst_28 : f32 to vector<16x1xf32>
    %66 = arith.mulf %62, %65 : vector<16x1xf32>
    %67 = arith.mulf %64, %64 : vector<16x1xf32>
    %68 = arith.subf %66, %67 : vector<16x1xf32>
    %cst_29 = arith.constant 0.000000e+00 : f32
    %69 = vector.broadcast %cst_29 : f32 to vector<16x1xf32>
    %70 = arith.maximumf %68, %69 : vector<16x1xf32>
    %cst_30 = arith.constant 9.99999974E-6 : f32
    %71 = vector.broadcast %cst_30 : f32 to vector<16x1xf32>
    %72 = arith.addf %70, %71 : vector<16x1xf32>
    %73 = math.rsqrt %72 : vector<16x1xf32>
    %74 = vector.broadcast %64 : vector<16x1xf32> to vector<16x128xf32>
    %75 = arith.subf %55, %74 : vector<16x128xf32>
    %76 = vector.broadcast %73 : vector<16x1xf32> to vector<16x128xf32>
    %77 = arith.mulf %75, %76 : vector<16x128xf32>
    %78 = vector.broadcast %56 : vector<1x128xf32> to vector<16x128xf32>
    %79 = arith.mulf %77, %78 : vector<16x128xf32>
    %80 = vector.broadcast %57 : vector<1x128xf32> to vector<16x128xf32>
    %81 = arith.addf %79, %80 : vector<16x128xf32>
    %cst_31 = arith.constant 0.000000e+00 : f32
    %82 = vector.broadcast %cst_31 : f32 to vector<16x128xf32>
    %83 = arith.maximumf %81, %82 : vector<16x128xf32>
    %c0_32 = arith.constant 0 : index
    %c0_33 = arith.constant 0 : index
    %84 = vector.load %arg12[%c0_32, %c0_33] : memref<128x256xf32, #tpu.memory_space<vmem>>, vector<128x256xf32>
    %cst_34 = arith.constant dense<0.000000e+00> : vector<16x256xf32>
    %85 = tpu.matmul %83, %84, %cst_34 {dimension_numbers = #tpu.dot_dimension_numbers<[1], [0], [0], [1], [0, 0, 1, 1], [], []>} : vector<16x128xf32>, vector<128x256xf32>, vector<16x256xf32> -> vector<16x256xf32>
    %c0_35 = arith.constant 0 : index
    %c0_36 = arith.constant 0 : index
    %86 = vector.load %arg13[%c0_35, %c0_36] : memref<1x256xf32, #tpu.memory_space<vmem>>, vector<1x256xf32>
    %87 = vector.broadcast %86 : vector<1x256xf32> to vector<16x256xf32>
    %88 = arith.addf %85, %87 : vector<16x256xf32>
    %c0_37 = arith.constant 0 : index
    %c0_38 = arith.constant 0 : index
    %89 = vector.load %arg14[%c0_37, %c0_38] : memref<1x256xf32, #tpu.memory_space<vmem>>, vector<1x256xf32>
    %c0_39 = arith.constant 0 : index
    %c0_40 = arith.constant 0 : index
    %90 = vector.load %arg15[%c0_39, %c0_40] : memref<1x256xf32, #tpu.memory_space<vmem>>, vector<1x256xf32>
    %cst_41 = arith.constant dense<0.000000e+00> : vector<16xf32>
    %91 = vector.multi_reduction <add>, %88, %cst_41 [1] : vector<16x256xf32> to vector<16xf32>
    %92 = vector.shape_cast %91 : vector<16xf32> to vector<16x1xf32>
    %93 = arith.mulf %88, %88 : vector<16x256xf32>
    %cst_42 = arith.constant dense<0.000000e+00> : vector<16xf32>
    %94 = vector.multi_reduction <add>, %93, %cst_42 [1] : vector<16x256xf32> to vector<16xf32>
    %95 = vector.shape_cast %94 : vector<16xf32> to vector<16x1xf32>
    %cst_43 = arith.constant 3.906250e-03 : f32
    %96 = vector.broadcast %cst_43 : f32 to vector<16x1xf32>
    %97 = arith.mulf %92, %96 : vector<16x1xf32>
    %cst_44 = arith.constant 3.906250e-03 : f32
    %98 = vector.broadcast %cst_44 : f32 to vector<16x1xf32>
    %99 = arith.mulf %95, %98 : vector<16x1xf32>
    %100 = arith.mulf %97, %97 : vector<16x1xf32>
    %101 = arith.subf %99, %100 : vector<16x1xf32>
    %cst_45 = arith.constant 0.000000e+00 : f32
    %102 = vector.broadcast %cst_45 : f32 to vector<16x1xf32>
    %103 = arith.maximumf %101, %102 : vector<16x1xf32>
    %cst_46 = arith.constant 9.99999974E-6 : f32
    %104 = vector.broadcast %cst_46 : f32 to vector<16x1xf32>
    %105 = arith.addf %103, %104 : vector<16x1xf32>
    %106 = math.rsqrt %105 : vector<16x1xf32>
    %107 = vector.broadcast %97 : vector<16x1xf32> to vector<16x256xf32>
    %108 = arith.subf %88, %107 : vector<16x256xf32>
    %109 = vector.broadcast %106 : vector<16x1xf32> to vector<16x256xf32>
    %110 = arith.mulf %108, %109 : vector<16x256xf32>
    %111 = vector.broadcast %89 : vector<1x256xf32> to vector<16x256xf32>
    %112 = arith.mulf %110, %111 : vector<16x256xf32>
    %113 = vector.broadcast %90 : vector<1x256xf32> to vector<16x256xf32>
    %114 = arith.addf %112, %113 : vector<16x256xf32>
    %cst_47 = arith.constant 0.000000e+00 : f32
    %115 = vector.broadcast %cst_47 : f32 to vector<16x256xf32>
    %116 = arith.maximumf %114, %115 : vector<16x256xf32>
    %c0_48 = arith.constant 0 : index
    %c0_49 = arith.constant 0 : index
    %117 = vector.load %arg16[%c0_48, %c0_49] : memref<256x512xf32, #tpu.memory_space<vmem>>, vector<256x512xf32>
    %cst_50 = arith.constant dense<0.000000e+00> : vector<16x512xf32>
    %118 = tpu.matmul %116, %117, %cst_50 {dimension_numbers = #tpu.dot_dimension_numbers<[1], [0], [0], [1], [0, 0, 1, 1], [], []>} : vector<16x256xf32>, vector<256x512xf32>, vector<16x512xf32> -> vector<16x512xf32>
    %c0_51 = arith.constant 0 : index
    %c0_52 = arith.constant 0 : index
    %119 = vector.load %arg17[%c0_51, %c0_52] : memref<1x512xf32, #tpu.memory_space<vmem>>, vector<1x512xf32>
    %120 = vector.broadcast %119 : vector<1x512xf32> to vector<16x512xf32>
    %121 = arith.addf %118, %120 : vector<16x512xf32>
    %c0_53 = arith.constant 0 : index
    %c0_54 = arith.constant 0 : index
    %122 = vector.load %arg18[%c0_53, %c0_54] : memref<1x512xf32, #tpu.memory_space<vmem>>, vector<1x512xf32>
    %c0_55 = arith.constant 0 : index
    %c0_56 = arith.constant 0 : index
    %123 = vector.load %arg19[%c0_55, %c0_56] : memref<1x512xf32, #tpu.memory_space<vmem>>, vector<1x512xf32>
    %cst_57 = arith.constant dense<0.000000e+00> : vector<16xf32>
    %124 = vector.multi_reduction <add>, %121, %cst_57 [1] : vector<16x512xf32> to vector<16xf32>
    %125 = vector.shape_cast %124 : vector<16xf32> to vector<16x1xf32>
    %126 = arith.mulf %121, %121 : vector<16x512xf32>
    %cst_58 = arith.constant dense<0.000000e+00> : vector<16xf32>
    %127 = vector.multi_reduction <add>, %126, %cst_58 [1] : vector<16x512xf32> to vector<16xf32>
    %128 = vector.shape_cast %127 : vector<16xf32> to vector<16x1xf32>
    %cst_59 = arith.constant 0.001953125 : f32
    %129 = vector.broadcast %cst_59 : f32 to vector<16x1xf32>
    %130 = arith.mulf %125, %129 : vector<16x1xf32>
    %cst_60 = arith.constant 0.001953125 : f32
    %131 = vector.broadcast %cst_60 : f32 to vector<16x1xf32>
    %132 = arith.mulf %128, %131 : vector<16x1xf32>
    %133 = arith.mulf %130, %130 : vector<16x1xf32>
    %134 = arith.subf %132, %133 : vector<16x1xf32>
    %cst_61 = arith.constant 0.000000e+00 : f32
    %135 = vector.broadcast %cst_61 : f32 to vector<16x1xf32>
    %136 = arith.maximumf %134, %135 : vector<16x1xf32>
    %cst_62 = arith.constant 9.99999974E-6 : f32
    %137 = vector.broadcast %cst_62 : f32 to vector<16x1xf32>
    %138 = arith.addf %136, %137 : vector<16x1xf32>
    %139 = math.rsqrt %138 : vector<16x1xf32>
    %140 = vector.broadcast %130 : vector<16x1xf32> to vector<16x512xf32>
    %141 = arith.subf %121, %140 : vector<16x512xf32>
    %142 = vector.broadcast %139 : vector<16x1xf32> to vector<16x512xf32>
    %143 = arith.mulf %141, %142 : vector<16x512xf32>
    %144 = vector.broadcast %122 : vector<1x512xf32> to vector<16x512xf32>
    %145 = arith.mulf %143, %144 : vector<16x512xf32>
    %146 = vector.broadcast %123 : vector<1x512xf32> to vector<16x512xf32>
    %147 = arith.addf %145, %146 : vector<16x512xf32>
    %cst_63 = arith.constant 0.000000e+00 : f32
    %148 = vector.broadcast %cst_63 : f32 to vector<16x512xf32>
    %149 = arith.maximumf %147, %148 : vector<16x512xf32>
    %cst_64 = arith.constant dense<0xFF800000> : vector<512xf32>
    %150 = vector.multi_reduction <maximumf>, %149, %cst_64 [0] : vector<16x512xf32> to vector<512xf32>
    %151 = vector.shape_cast %150 : vector<512xf32> to vector<1x512xf32>
    %152 = vector.shape_cast %151 : vector<1x512xf32> to vector<1x1x1x512xf32>
    %c0_i32 = arith.constant 0 : i32
    %153 = arith.cmpi eq, %arg2, %c0_i32 : i32
    %154 = arith.extui %153 : i1 to i32
    %c0_i32_65 = arith.constant 0 : i32
    %155 = arith.cmpi ne, %154, %c0_i32_65 : i32
    scf.if %155 {
      %cst_74 = arith.constant 0xFF800000 : f32
      %159 = vector.broadcast %cst_74 : f32 to vector<1x1x1x512xf32>
      %c0_75 = arith.constant 0 : index
      %c0_76 = arith.constant 0 : index
      %c0_77 = arith.constant 0 : index
      %c0_78 = arith.constant 0 : index
      %160 = vector.load %arg20[%c0_75, %c0_76, %c0_77, %c0_78] : memref<1x1x1x512xf32, #tpu.memory_space<vmem>>, vector<1x1x1x512xf32>
      tpu.vector_store %arg20[%c0_75, %c0_76, %c0_77, %c0_78], %159 {strides = array<i32>} : memref<1x1x1x512xf32, #tpu.memory_space<vmem>>, vector<1x1x1x512xf32>,
    } else {
    }
    %c0_66 = arith.constant 0 : index
    %c0_67 = arith.constant 0 : index
    %c0_68 = arith.constant 0 : index
    %c0_69 = arith.constant 0 : index
    %156 = vector.load %arg20[%c0_66, %c0_67, %c0_68, %c0_69] : memref<1x1x1x512xf32, #tpu.memory_space<vmem>>, vector<1x1x1x512xf32>
    %157 = arith.maximumf %156, %152 : vector<1x1x1x512xf32>
    %c0_70 = arith.constant 0 : index
    %c0_71 = arith.constant 0 : index
    %c0_72 = arith.constant 0 : index
    %c0_73 = arith.constant 0 : index
    %158 = vector.load %arg20[%c0_70, %c0_71, %c0_72, %c0_73] : memref<1x1x1x512xf32, #tpu.memory_space<vmem>>, vector<1x1x1x512xf32>
    tpu.vector_store %arg20[%c0_70, %c0_71, %c0_72, %c0_73], %157 {strides = array<i32>} : memref<1x1x1x512xf32, #tpu.memory_space<vmem>>, vector<1x1x1x512xf32>,
    return
  }
  func.func @transform_0(%arg0: i32, %arg1: i32, %arg2: i32) -> (i32, i32, i32) {
    %c1_i32 = arith.constant 1 : i32
    %0 = arith.muli %arg0, %c1_i32 : i32
    %1 = arith.addi %0, %arg2 : i32
    %c0_i32 = arith.constant 0 : i32
    %c0_i32_0 = arith.constant 0 : i32
    return %arg1, %1, %c0_i32 : i32, i32, i32
  }
  func.func @transform_1(%arg0: i32, %arg1: i32, %arg2: i32) -> (i32, i32) {
    %c0_i32 = arith.constant 0 : i32
    %c0_i32_0 = arith.constant 0 : i32
    %c0_i32_1 = arith.constant 0 : i32
    return %c0_i32, %c0_i32_0 : i32, i32
  }
  func.func @transform_2(%arg0: i32, %arg1: i32, %arg2: i32) -> (i32, i32) {
    %c0_i32 = arith.constant 0 : i32
    %c0_i32_0 = arith.constant 0 : i32
    %c0_i32_1 = arith.constant 0 : i32
    return %c0_i32, %c0_i32_0 : i32, i32
  }
  func.func @transform_3(%arg0: i32, %arg1: i32, %arg2: i32) -> (i32, i32) {
    %c0_i32 = arith.constant 0 : i32
    %c0_i32_0 = arith.constant 0 : i32
    %c0_i32_1 = arith.constant 0 : i32
    return %c0_i32, %c0_i32_0 : i32, i32
  }
  func.func @transform_4(%arg0: i32, %arg1: i32, %arg2: i32) -> (i32, i32) {
    %c0_i32 = arith.constant 0 : i32
    %c0_i32_0 = arith.constant 0 : i32
    %c0_i32_1 = arith.constant 0 : i32
    return %c0_i32, %c0_i32_0 : i32, i32
  }
  func.func @transform_5(%arg0: i32, %arg1: i32, %arg2: i32) -> (i32, i32) {
    %c0_i32 = arith.constant 0 : i32
    %c0_i32_0 = arith.constant 0 : i32
    %c0_i32_1 = arith.constant 0 : i32
    return %c0_i32, %c0_i32_0 : i32, i32
  }
  func.func @transform_6(%arg0: i32, %arg1: i32, %arg2: i32) -> (i32, i32) {
    %c0_i32 = arith.constant 0 : i32
    %c0_i32_0 = arith.constant 0 : i32
    %c0_i32_1 = arith.constant 0 : i32
    return %c0_i32, %c0_i32_0 : i32, i32
  }
  func.func @transform_7(%arg0: i32, %arg1: i32, %arg2: i32) -> (i32, i32) {
    %c0_i32 = arith.constant 0 : i32
    %c0_i32_0 = arith.constant 0 : i32
    %c0_i32_1 = arith.constant 0 : i32
    return %c0_i32, %c0_i32_0 : i32, i32
  }
  func.func @transform_8(%arg0: i32, %arg1: i32, %arg2: i32) -> (i32, i32) {
    %c0_i32 = arith.constant 0 : i32
    %c0_i32_0 = arith.constant 0 : i32
    %c0_i32_1 = arith.constant 0 : i32
    return %c0_i32, %c0_i32_0 : i32, i32
  }
  func.func @transform_9(%arg0: i32, %arg1: i32, %arg2: i32) -> (i32, i32) {
    %c0_i32 = arith.constant 0 : i32
    %c0_i32_0 = arith.constant 0 : i32
    %c0_i32_1 = arith.constant 0 : i32
    return %c0_i32, %c0_i32_0 : i32, i32
  }
  func.func @transform_10(%arg0: i32, %arg1: i32, %arg2: i32) -> (i32, i32) {
    %c0_i32 = arith.constant 0 : i32
    %c0_i32_0 = arith.constant 0 : i32
    %c0_i32_1 = arith.constant 0 : i32
    return %c0_i32, %c0_i32_0 : i32, i32
  }
  func.func @transform_11(%arg0: i32, %arg1: i32, %arg2: i32) -> (i32, i32) {
    %c0_i32 = arith.constant 0 : i32
    %c0_i32_0 = arith.constant 0 : i32
    %c0_i32_1 = arith.constant 0 : i32
    return %c0_i32, %c0_i32_0 : i32, i32
  }
  func.func @transform_12(%arg0: i32, %arg1: i32, %arg2: i32) -> (i32, i32) {
    %c0_i32 = arith.constant 0 : i32
    %c0_i32_0 = arith.constant 0 : i32
    %c0_i32_1 = arith.constant 0 : i32
    return %c0_i32, %c0_i32_0 : i32, i32
  }
  func.func @transform_13(%arg0: i32, %arg1: i32, %arg2: i32) -> (i32, i32) {
    %c0_i32 = arith.constant 0 : i32
    %c0_i32_0 = arith.constant 0 : i32
    %c0_i32_1 = arith.constant 0 : i32
    return %c0_i32, %c0_i32_0 : i32, i32
  }
  func.func @transform_14(%arg0: i32, %arg1: i32, %arg2: i32) -> (i32, i32) {
    %c0_i32 = arith.constant 0 : i32
    %c0_i32_0 = arith.constant 0 : i32
    %c0_i32_1 = arith.constant 0 : i32
    return %c0_i32, %c0_i32_0 : i32, i32
  }
  func.func @transform_15(%arg0: i32, %arg1: i32, %arg2: i32) -> (i32, i32) {
    %c0_i32 = arith.constant 0 : i32
    %c0_i32_0 = arith.constant 0 : i32
    %c0_i32_1 = arith.constant 0 : i32
    return %c0_i32, %c0_i32_0 : i32, i32
  }
  func.func @transform_16(%arg0: i32, %arg1: i32, %arg2: i32) -> (i32, i32) {
    %c0_i32 = arith.constant 0 : i32
    %c0_i32_0 = arith.constant 0 : i32
    %c0_i32_1 = arith.constant 0 : i32
    return %c0_i32, %c0_i32_0 : i32, i32
  }
  func.func @transform_17(%arg0: i32, %arg1: i32, %arg2: i32) -> (i32, i32, i32, i32) {
    %c0_i32 = arith.constant 0 : i32
    %c0_i32_0 = arith.constant 0 : i32
    %c0_i32_1 = arith.constant 0 : i32
    return %arg0, %arg1, %c0_i32, %c0_i32_0 : i32, i32, i32, i32
  }
}

</mosaic_0001>

<bundles_post_ra>
// kernel: pointnet_encoder.1
= control target key start
LH: loop header
LB: loop body
LE: loop exit
PB: predicated region body
PF: predicated region fallthrough
CT: control target
= control target key end

     0   :  { %s3655_s0 = inlined_call_operand.vmem [shape: f32[2,16,3], index: 0, kind: input, shape index: {}]   ;;  %s3656_s1 = inlined_call_operand.hbm [shape: f32[3,64], index: 1, kind: input, shape index: {}]   ;;  %s3657_s2 = inlined_call_operand.hbm [shape: f32[1,64], index: 2, kind: input, shape index: {}]   ;;  %s3658_s3 = inlined_call_operand.hbm [shape: f32[1,64], index: 3, kind: input, shape index: {}]   ;;  %s3659_s4 = inlined_call_operand.hbm [shape: f32[1,64], index: 4, kind: input, shape index: {}]   ;;  %s3660_s5 = inlined_call_operand.hbm [shape: f32[64,128], index: 5, kind: input, shape index: {}]   ;;  %s3661_s6 = inlined_call_operand.hbm [shape: f32[1,128], index: 6, kind: input, shape index: {}]   ;;  %s3662_s7 = inlined_call_operand.hbm [shape: f32[1,128], index: 7, kind: input, shape index: {}]   ;;  %s3663_s8 = inlined_call_operand.hbm [shape: f32[1,128], index: 8, kind: input, shape index: {}]   ;;  %s3664_s9 = inlined_call_operand.hbm [shape: f32[128,256], index: 9, kind: input, shape index: {}]   ;;  %s3665_s10 = inlined_call_operand.hbm [shape: f32[1,256], index: 10, kind: input, shape index: {}]   ;;  %s3666_s11 = inlined_call_operand.hbm [shape: f32[1,256], index: 11, kind: input, shape index: {}]   ;;  %s3667_s12 = inlined_call_operand.hbm [shape: f32[1,256], index: 12, kind: input, shape index: {}]   ;;  %s3668_s13 = inlined_call_operand.hbm [shape: f32[256,512], index: 13, kind: input, shape index: {}]   ;;  %s3669_s14 = inlined_call_operand.hbm [shape: f32[1,512], index: 14, kind: input, shape index: {}]   ;;  %s3670_s15 = inlined_call_operand.hbm [shape: f32[1,512], index: 15, kind: input, shape index: {}]   ;;  %s3671_s16 = inlined_call_operand.hbm [shape: f32[1,512], index: 16, kind: input, shape index: {}]   ;;  %s3672_s17 = inlined_call_operand.vmem [shape: f32[1,2,1,512], index: 17, kind: output, shape index: {}]  }
   0x1   :  { %3682 = sst [smem:[#allocation40_spill]] %s3655_s0 }
   0x2   :  { %3683 = sst [smem:[#allocation41_spill]] %s3656_s1 }
   0x3   :  { %3684 = sst [smem:[#allocation42_spill]] %s3657_s2 }
   0x4   :  { %3685 = sst [smem:[#allocation43_spill]] %s3658_s3 }
   0x5   :  { %3686 = sst [smem:[#allocation44_spill]] %s3659_s4 }
   0x6   :  { %3687 = sst [smem:[#allocation45_spill]] %s3661_s6 }
   0x7   :  { %3688 = sst [smem:[#allocation46_spill]] %s3663_s8 }
   0x8   :  { %3689 = sst [smem:[#allocation47_spill]] %s3672_s17 }
   0x9   :  { %22 = vsyncpa [#allocation3], 0 }
   0xa   :  { %23 = vsyncpa [#allocation5], 0 }
   0xb   :  { %24 = vsyncpa [#allocation8], 0 }
   0xc   :  { %25 = vsyncpa [#allocation11], 0 }
   0xd   :  { %26 = vsyncpa [#allocation14], 0 }
   0xe   :  { %27 = vsyncpa [#allocation17], 0 }
   0xf   :  { %28 = vsyncpa [#allocation20], 0 }
  0x10   :  { %29 = vsyncpa [#allocation23], 0 }
  0x11   :  { %30 = vsyncpa [#allocation26], 0  ;;  %s3104_s24 = smov 0   ;;  %s3106_s25 = smov 0  }
  0x12   :  { %s3108_s26 = smov 0  }
  0x13 LB: > { %3690 = sst [smem:[#allocation36_spill]] %s2976_s24  ;;  %s2986_s27 = smov [#allocation4]   ;;  %s2984_s26 = sphi %s3108_s26, %s36_s26   ;;  %s2980_s25 = sphi %s3106_s25, %s3716_s25   ;;  %s2976_s24 = sphi %s3104_s24, %s3715_s24  }
  0x14   : > { %3691 = sst [smem:[#allocation37_spill]] %s2984_s26  ;;  %s478_s28 = sshll.u32 %s2986_s27, 4  ;;  %s3126_s28 = int_to_ptr.vmem [resolvable:$true] %s478_s28 }
  0x15   : > { %s2003_s29 = sadd.s32 4294967295, %s2984_s26   ;;  %p2005_p0 = scmp.ge.s32.totalorder %s2984_s26, 1 }
  0x16   : > { %p454_p1 = scmp.lt.s32.totalorder %s2984_s26, 3  ;;  %p3122_p2 = scmp.eq.s32.totalorder %s2003_s29, 0 }
  0x17   : > { %s2987_s18 = smov [#allocation7]   ;;  %s2988_s1 = smov [#allocation10]  }
  0x18   : > { %s3692_s0 = scalar_select %p3122_p2, 1, 0 }
  0x19   : > { %p3128_p3 = pnand %p2005_p0, %p454_p1  ;;  %s500_s19 = sshll.u32 %s2987_s18, 4  ;;  %s3134_s19 = int_to_ptr.vmem [resolvable:$true] %s500_s19 }
  0x1a   : > { %3693 = sst [smem:[#allocation38_spill]] %s3692_s0  ;;  %s524_s20 = sshll.u32 %s2988_s1, 4  ;;  %s3142_s20 = int_to_ptr.vmem [resolvable:$true] %s524_s20 }
  0x1b   : > { %s3694_s30 = scalar_select %p3128_p3, 1, 0 }
  0x1c   : > { %p2323_p4 = pneg %p3128_p3  ;;  %s2989_s22 = smov [#allocation13]  }
  0x1d   : > { %3695 = sst [smem:[#allocation39_spill]] %s3694_s30  ;;  %s546_s23 = sshll.u32 %s2989_s22, 4  ;;  %s3144_s23 = int_to_ptr.vmem [resolvable:$true] %s546_s23 }
  0x1e   : > { %p3138_p5 = pnand %p3122_p2, %p2323_p4  ;;  %s3697_s2 = sld [smem:[#allocation42_spill]] }
  0x20   : > { %p3154_p7 = pneg %p3138_p5 }
  0x24   : > { %s2478_s18 = scalar_lea.hbm %s3697_s2, 16 }
  0x25   : > { %p2479_p6 = scmp.ne.s32.totalorder %s3697_s2, %s2478_s18  ;;  %p2485_p10 = scmp.lt.u32.totalorder %s2478_s18, %s3697_s2 }
  0x27   : > { %p2481_p8 = pnand %p3154_p7, %p2479_p6 }
  0x29   : > { %p2482_p9 = pneg %p2481_p8 }
  0x2b   : > { %p2487_p11 = pnand %p2485_p10, %p2482_p9 }
  0x2d   : > { %2490 = shalt.err (!%p2487_p11)
}
  0x2e   : > { %s2491_s17 = scalar_lea.vmem %s3126_s28, 16  ;;  %s2498_s26 = scalar_lea.vmem %s3126_s28, 32 }
  0x2f   : > { %p2492_p12 = scmp.ne.s32.totalorder %s3126_s28, %s2491_s17  ;;  %p2499_p1 = scmp.lt.s32.totalorder %s3126_s28, %s3126_s28 }
  0x30   : > { %p2500_p4 = scmp.lt.s32.totalorder %s2498_s26, %s2491_s17 }
  0x31   : > { %p2494_p13 = pnand %p2492_p12, %p3154_p7 }
  0x32   : > { %p2501_p6 = por %p2500_p4, %p2499_p1 }
  0x33   : > { %p2495_p0 = pneg %p2494_p13 }
  0x35   : > { %p2502_p8 = pnand %p2501_p6, %p2495_p0 }
  0x37   : > { %2505 = shalt.err (!%p2502_p8)
}
  0x38   : > { %2329 = dma.hbm_to_vmem [thread:$0]  (!%p3138_p5), %s3697_s2, 16, %s3126_s28, [#allocation5]  }
  0x39   : > { %s3699_s4 = sld [smem:[#allocation44_spill]] }
  0x3f   : > { %s2506_s22 = scalar_lea.hbm %s3699_s4, 16 }
  0x40   : > { %p2507_p9 = scmp.ne.s32.totalorder %s3699_s4, %s2506_s22  ;;  %p2513_p12 = scmp.lt.u32.totalorder %s2506_s22, %s3699_s4 }
  0x42   : > { %p2509_p10 = pnand %p2507_p9, %p3154_p7 }
  0x44   : > { %p2510_p11 = pneg %p2509_p10 }
  0x46   : > { %p2515_p13 = pnand %p2513_p12, %p2510_p11 }
  0x48   : > { %2518 = shalt.err (!%p2515_p13)
}
  0x49   : > { %s2519_s28 = scalar_lea.vmem %s3134_s19, 16  ;;  %s2526_s0 = scalar_lea.vmem %s3134_s19, 32 }
  0x4a   : > { %p2520_p0 = scmp.ne.s32.totalorder %s3134_s19, %s2519_s28  ;;  %p2527_p6 = scmp.lt.s32.totalorder %s3134_s19, %s3134_s19 }
  0x4b   : > { %p2528_p8 = scmp.lt.s32.totalorder %s2526_s0, %s2519_s28 }
  0x4c   : > { %p2522_p1 = pnand %p2520_p0, %p3154_p7 }
  0x4d   : > { %p2529_p9 = por %p2528_p8, %p2527_p6 }
  0x4e   : > { %p2523_p4 = pneg %p2522_p1 }
  0x50   : > { %p2530_p10 = pnand %p2529_p9, %p2523_p4 }
  0x52   : > { %2533 = shalt.err (!%p2530_p10)
}
  0x53   : > { %2335 = dma.hbm_to_vmem [thread:$0]  (!%p3138_p5), %s3699_s4, 16, %s3134_s19, [#allocation8]  }
  0x54   : > { %s3700_s6 = sld [smem:[#allocation45_spill]] }
  0x5a   : > { %s2534_s18 = scalar_lea.hbm %s3700_s6, 16 }
  0x5b   : > { %p2535_p11 = scmp.ne.s32.totalorder %s3700_s6, %s2534_s18  ;;  %p2541_p0 = scmp.lt.u32.totalorder %s2534_s18, %s3700_s6 }
  0x5d   : > { %p2537_p12 = pnand %p2535_p11, %p3154_p7 }
  0x5f   : > { %p2538_p13 = pneg %p2537_p12 }
  0x61   : > { %p2543_p1 = pnand %p2541_p0, %p2538_p13 }
  0x63   : > { %2546 = shalt.err (!%p2543_p1)
}
  0x64   : > { %s2547_s19 = scalar_lea.vmem %s3142_s20, 16  ;;  %s2554_s0 = scalar_lea.vmem %s3142_s20, 32 }
  0x65   : > { %p2548_p4 = scmp.ne.s32.totalorder %s3142_s20, %s2547_s19  ;;  %p2555_p9 = scmp.lt.s32.totalorder %s3142_s20, %s3142_s20 }
  0x66   : > { %p2556_p10 = scmp.lt.s32.totalorder %s2554_s0, %s2547_s19 }
  0x67   : > { %p2550_p6 = pnand %p2548_p4, %p3154_p7 }
  0x68   : > { %p2557_p11 = por %p2556_p10, %p2555_p9 }
  0x69   : > { %p2551_p8 = pneg %p2550_p6 }
  0x6b   : > { %p2558_p12 = pnand %p2557_p11, %p2551_p8 }
  0x6d   : > { %2561 = shalt.err (!%p2558_p12)
}
  0x6e   : > { %2341 = dma.hbm_to_vmem [thread:$0]  (!%p3138_p5), %s3700_s6, 16, %s3142_s20, [#allocation11]  }
  0x6f   : > { %s3701_s8 = sld [smem:[#allocation46_spill]] }
  0x75   : > { %s2562_s18 = scalar_lea.hbm %s3701_s8, 16 }
  0x76   : > { %p2563_p13 = scmp.ne.s32.totalorder %s3701_s8, %s2562_s18  ;;  %p2569_p4 = scmp.lt.u32.totalorder %s2562_s18, %s3701_s8 }
  0x78   : > { %p2565_p0 = pnand %p2563_p13, %p3154_p7 }
  0x7a   : > { %p2566_p1 = pneg %p2565_p0 }
  0x7c   : > { %p2571_p6 = pnand %p2569_p4, %p2566_p1 }
  0x7e   : > { %2574 = shalt.err (!%p2571_p6)
}
  0x7f   : > { %s2575_s20 = scalar_lea.vmem %s3144_s23, 16  ;;  %s2582_s19 = scalar_lea.vmem %s3144_s23, 32 }
  0x80   : > { %p2576_p8 = scmp.ne.s32.totalorder %s3144_s23, %s2575_s20  ;;  %p2583_p11 = scmp.lt.s32.totalorder %s3144_s23, %s3144_s23 }
  0x81   : > { %p2584_p12 = scmp.lt.s32.totalorder %s2582_s19, %s2575_s20 }
  0x82   : > { %p2578_p9 = pnand %p2576_p8, %p3154_p7 }
  0x83   : > { %p2585_p13 = por %p2584_p12, %p2583_p11 }
  0x84   : > { %p2579_p10 = pneg %p2578_p9 }
  0x86   : > { %p2586_p0 = pnand %p2585_p13, %p2579_p10 }
  0x88   : > { %2589 = shalt.err (!%p2586_p0)
}
  0x89   : > { %2347 = dma.hbm_to_vmem [thread:$0]  (!%p3138_p5), %s3701_s8, 16, %s3144_s23, [#allocation14]  }
  0x8a   : > { %s2990_s24 = smov [#allocation16]   ;;  %s2991_s29 = smov [#allocation19]  }
  0x8b   : > { %s570_s27 = sshll.u32 %s2990_s24, 4  ;;  %s592_s18 = sshll.u32 %s2991_s29, 4  ;;  %s571_s27 = int_to_ptr.vmem [resolvable:$true] %s570_s27  ;;  %s593_s18 = int_to_ptr.vmem [resolvable:$true] %s592_s18 }
  0x8c   : > { %s2590_s26 = scalar_lea.hbm %s3665_s10, 32 }
  0x8d   : > { %p2591_p1 = scmp.ne.s32.totalorder %s3665_s10, %s2590_s26  ;;  %p2597_p8 = scmp.lt.u32.totalorder %s2590_s26, %s3665_s10 }
  0x8f   : > { %p2593_p4 = pnand %p2591_p1, %p3154_p7 }
  0x91   : > { %p2594_p6 = pneg %p2593_p4 }
  0x93   : > { %p2599_p9 = pnand %p2597_p8, %p2594_p6 }
  0x95   : > { %2602 = shalt.err (!%p2599_p9)
}
  0x96   : > { %s2603_s23 = scalar_lea.vmem %s571_s27, 32  ;;  %p2611_p13 = scmp.lt.s32.totalorder %s571_s27, %s571_s27 }
  0x97   : > { %p2604_p10 = scmp.ne.s32.totalorder %s571_s27, %s2603_s23  ;;  %p2612_p0 = scmp.lt.s32.totalorder %s2603_s23, %s2603_s23 }
  0x99   : > { %p2606_p11 = pnand %p2604_p10, %p3154_p7  ;;  %p2613_p2 = por %p2612_p0, %p2611_p13 }
  0x9b   : > { %p2607_p12 = pneg %p2606_p11 }
  0x9d   : > { %p2614_p3 = pnand %p2613_p2, %p2607_p12 }
  0x9f   : > { %2617 = shalt.err (!%p2614_p3)
}
  0xa0   : > { %2353 = dma.hbm_to_vmem [thread:$0]  (!%p3138_p5), %s3665_s10, 32, %s571_s27, [#allocation17]  }
  0xa1   : > { %s2618_s17 = scalar_lea.hbm %s3667_s12, 32 }
  0xa2   : > { %p2619_p1 = scmp.ne.s32.totalorder %s3667_s12, %s2618_s17  ;;  %p2625_p3 = scmp.lt.u32.totalorder %s2618_s17, %s3667_s12 }
  0xa4   : > { %p2621_p4 = pnand %p2619_p1, %p3154_p7 }
  0xa6   : > { %p2622_p2 = pneg %p2621_p4 }
  0xa8   : > { %p2627_p6 = pnand %p2625_p3, %p2622_p2 }
  0xaa   : > { %2630 = shalt.err (!%p2627_p6)
}
  0xab   : > { %s2631_s0 = scalar_lea.vmem %s593_s18, 32  ;;  %p2639_p11 = scmp.lt.s32.totalorder %s593_s18, %s593_s18 }
  0xac   : > { %p2632_p8 = scmp.ne.s32.totalorder %s593_s18, %s2631_s0  ;;  %p2640_p12 = scmp.lt.s32.totalorder %s2631_s0, %s2631_s0 }
  0xae   : > { %p2634_p9 = pnand %p2632_p8, %p3154_p7  ;;  %p2641_p13 = por %p2640_p12, %p2639_p11 }
  0xb0   : > { %p2635_p10 = pneg %p2634_p9 }
  0xb2   : > { %p2642_p0 = pnand %p2641_p13, %p2635_p10 }
  0xb4   : > { %2645 = shalt.err (!%p2642_p0)
}
  0xb5   : > { %2359 = dma.hbm_to_vmem [thread:$0]  (!%p3138_p5), %s3667_s12, 32, %s593_s18, [#allocation20]  }
  0xb6   : > { %s2992_s30 = smov [#allocation22]   ;;  %s2646_s17 = scalar_lea.hbm %s3669_s14, 64 }
  0xb7   : > { %s616_s24 = sshll.u32 %s2992_s30, 4  ;;  %p2647_p1 = scmp.ne.s32.totalorder %s3669_s14, %s2646_s17  ;;  %s617_s24 = int_to_ptr.vmem [resolvable:$true] %s616_s24 }
  0xb8   : > { %p2653_p3 = scmp.lt.u32.totalorder %s2646_s17, %s3669_s14 }
  0xb9   : > { %p2649_p4 = pnand %p2647_p1, %p3154_p7 }
  0xbb   : > { %p2650_p2 = pneg %p2649_p4 }
  0xbd   : > { %p2655_p6 = pnand %p2653_p3, %p2650_p2 }
  0xbf   : > { %2658 = shalt.err (!%p2655_p6)
}
  0xc0   : > { %s2659_s18 = scalar_lea.vmem %s617_s24, 64  ;;  %p2667_p11 = scmp.lt.s32.totalorder %s617_s24, %s617_s24 }
  0xc1   : > { %p2660_p8 = scmp.ne.s32.totalorder %s617_s24, %s2659_s18  ;;  %p2668_p12 = scmp.lt.s32.totalorder %s2659_s18, %s2659_s18 }
  0xc3   : > { %p2662_p9 = pnand %p2660_p8, %p3154_p7  ;;  %p2669_p13 = por %p2668_p12, %p2667_p11 }
  0xc5   : > { %p2663_p10 = pneg %p2662_p9 }
  0xc7   : > { %p2670_p0 = pnand %p2669_p13, %p2663_p10 }
  0xc9   : > { %2673 = shalt.err (!%p2670_p0)
}
  0xca   : > { %2365 = dma.hbm_to_vmem [thread:$0]  (!%p3138_p5), %s3669_s14, 64, %s617_s24, [#allocation23]  }
  0xcb   : > { %s51_s23 = sadd.s32 1, %s2980_s25  ;;  %s2993_s30 = smov [#allocation2]  }
  0xcc   : > { %p53_p1 = scmp.ge.s32.totalorder %s51_s23, 2  ;;  %s467_s29 = sshll.u32 %s2993_s30, 4  ;;  %s468_s29 = int_to_ptr.vmem [resolvable:$true] %s467_s29 }
  0xcd   : > { %s3702_s26 = sld [smem:[#allocation41_spill]] }
  0xce   : > { %s3718_s23 = smov (%p53_p1, %s51_s23), 0 }
  0xd3   : > { %s3703_s28 = smov %s3702_s26  ;;  %s2674_s20 = scalar_lea.hbm %s3702_s26, 64 }
  0xd4   : > { %p2675_p4 = scmp.ne.s32.totalorder %s3703_s28, %s2674_s20  ;;  %p2681_p6 = scmp.lt.u32.totalorder %s2674_s20, %s3703_s28 }
  0xd6   : > { %p2677_p2 = pnand %p2675_p4, %p3154_p7 }
  0xd8   : > { %p2678_p3 = pneg %p2677_p2 }
  0xda   : > { %p2683_p8 = pnand %p2681_p6, %p2678_p3 }
  0xdc   : > { %2686 = shalt.err (!%p2683_p8)
}
  0xdd   : > { %s2687_s27 = scalar_lea.vmem %s468_s29, 64  ;;  %p2695_p12 = scmp.lt.s32.totalorder %s468_s29, %s468_s29 }
  0xde   : > { %p2688_p9 = scmp.ne.s32.totalorder %s468_s29, %s2687_s27  ;;  %p2696_p13 = scmp.lt.s32.totalorder %s2687_s27, %s2687_s27 }
  0xe0   : > { %p2690_p10 = pnand %p2688_p9, %p3154_p7  ;;  %p2697_p0 = por %p2696_p13, %p2695_p12 }
  0xe2   : > { %p2691_p11 = pneg %p2690_p10 }
  0xe4   : > { %p2698_p1 = pnand %p2697_p0, %p2691_p11 }
  0xe6   : > { %2701 = shalt.err (!%p2698_p1)
}
  0xe7   : > { %2326 = dma.hbm_to_vmem [thread:$0]  (!%p3138_p5), %s3703_s28, 64, %s468_s29, [#allocation3]  }
  0xe8   : > { %s2994_s17 = smov [#allocation6]   ;;  %s2995_s20 = smov [#allocation9]  }
  0xe9   : > { %s489_s26 = sshll.u32 %s2994_s17, 4  ;;  %s510_s19 = sshll.u32 %s2995_s20, 4  ;;  %s490_s26 = int_to_ptr.vmem [resolvable:$true] %s489_s26  ;;  %s511_s19 = int_to_ptr.vmem [resolvable:$true] %s510_s19 }
  0xea   : > { %s3704_s3 = sld [smem:[#allocation43_spill]] }
  0xf0   : > { %s2702_s24 = scalar_lea.hbm %s3704_s3, 16 }
  0xf1   : > { %p2703_p4 = scmp.ne.s32.totalorder %s3704_s3, %s2702_s24  ;;  %p2709_p6 = scmp.lt.u32.totalorder %s2702_s24, %s3704_s3 }
  0xf3   : > { %p2705_p2 = pnand %p2703_p4, %p3154_p7 }
  0xf5   : > { %p2706_p3 = pneg %p2705_p2 }
  0xf7   : > { %p2711_p8 = pnand %p2709_p6, %p2706_p3 }
  0xf9   : > { %2714 = shalt.err (!%p2711_p8)
}
  0xfa   : > { %s2715_s29 = scalar_lea.vmem %s490_s26, 16  ;;  %s2722_s22 = scalar_lea.vmem %s490_s26, 32 }
  0xfb   : > { %p2716_p9 = scmp.ne.s32.totalorder %s490_s26, %s2715_s29  ;;  %p2723_p12 = scmp.lt.s32.totalorder %s490_s26, %s490_s26 }
  0xfc   : > { %p2724_p13 = scmp.lt.s32.totalorder %s2722_s22, %s2715_s29 }
  0xfd   : > { %p2718_p10 = pnand %p2716_p9, %p3154_p7 }
  0xfe   : > { %p2725_p0 = por %p2724_p13, %p2723_p12 }
  0xff   : > { %p2719_p11 = pneg %p2718_p10 }
 0x101   : > { %p2726_p1 = pnand %p2725_p0, %p2719_p11 }
 0x103   : > { %2729 = shalt.err (!%p2726_p1)
}
 0x104   : > { %2332 = dma.hbm_to_vmem [thread:$0]  (!%p3138_p5), %s3704_s3, 16, %s490_s26, [#allocation5]  }
 0x105   : > { %s2730_s18 = scalar_lea.hbm %s3660_s5, 1024 }
 0x106   : > { %p2731_p4 = scmp.ne.s32.totalorder %s3660_s5, %s2730_s18  ;;  %p2737_p6 = scmp.lt.u32.totalorder %s2730_s18, %s3660_s5 }
 0x108   : > { %p2733_p2 = pnand %p2731_p4, %p3154_p7 }
 0x10a   : > { %p2734_p3 = pneg %p2733_p2 }
 0x10c   : > { %p2739_p8 = pnand %p2737_p6, %p2734_p3 }
 0x10e   : > { %2742 = shalt.err (!%p2739_p8)
}
 0x10f   : > { %s2743_s29 = scalar_lea.vmem %s511_s19, 1024  ;;  %p2751_p12 = scmp.lt.s32.totalorder %s511_s19, %s511_s19 }
 0x110   : > { %p2744_p9 = scmp.ne.s32.totalorder %s511_s19, %s2743_s29  ;;  %p2752_p13 = scmp.lt.s32.totalorder %s2743_s29, %s2743_s29 }
 0x112   : > { %p2746_p10 = pnand %p2744_p9, %p3154_p7  ;;  %p2753_p0 = por %p2752_p13, %p2751_p12 }
 0x114   : > { %p2747_p11 = pneg %p2746_p10 }
 0x116   : > { %p2754_p1 = pnand %p2753_p0, %p2747_p11 }
 0x118   : > { %2757 = shalt.err (!%p2754_p1)
}
 0x119   : > { %s2996_s26 = smov 128   ;;  %s2997_s22 = smov 8  }
 0x11a   : > { %2338 = dma.hbm_to_vmem [thread:$0]  (!%p3138_p5), %s3660_s5, 1024, %s511_s19, [#allocation8], %s2996_s26, %s2996_s26, %s2997_s22  }
 0x11b   : > { %s2998_s4 = smov [#allocation12]   ;;  %s2999_s18 = smov [#allocation15]  }
 0x11c   : > { %s535_s20 = sshll.u32 %s2998_s4, 4  ;;  %s556_s0 = sshll.u32 %s2999_s18, 4  ;;  %s536_s20 = int_to_ptr.vmem [resolvable:$true] %s535_s20  ;;  %s557_s0 = int_to_ptr.vmem [resolvable:$true] %s556_s0 }
 0x11d   : > { %s2758_s30 = scalar_lea.hbm %s3662_s7, 16 }
 0x11e   : > { %p2759_p4 = scmp.ne.s32.totalorder %s3662_s7, %s2758_s30  ;;  %p2765_p6 = scmp.lt.u32.totalorder %s2758_s30, %s3662_s7 }
 0x120   : > { %p2761_p2 = pnand %p2759_p4, %p3154_p7 }
 0x122   : > { %p2762_p3 = pneg %p2761_p2 }
 0x124   : > { %p2767_p8 = pnand %p2765_p6, %p2762_p3 }
 0x126   : > { %2770 = shalt.err (!%p2767_p8)
}
 0x127   : > { %s2771_s19 = scalar_lea.vmem %s536_s20, 16  ;;  %s2778_s26 = scalar_lea.vmem %s536_s20, 32 }
 0x128   : > { %p2772_p9 = scmp.ne.s32.totalorder %s536_s20, %s2771_s19  ;;  %p2779_p12 = scmp.lt.s32.totalorder %s536_s20, %s536_s20 }
 0x129   : > { %p2780_p13 = scmp.lt.s32.totalorder %s2778_s26, %s2771_s19 }
 0x12a   : > { %p2774_p10 = pnand %p2772_p9, %p3154_p7 }
 0x12b   : > { %p2781_p0 = por %p2780_p13, %p2779_p12 }
 0x12c   : > { %p2775_p11 = pneg %p2774_p10 }
 0x12e   : > { %p2782_p1 = pnand %p2781_p0, %p2775_p11 }
 0x130   : > { %2785 = shalt.err (!%p2782_p1)
}
 0x131   : > { %2344 = dma.hbm_to_vmem [thread:$0]  (!%p3138_p5), %s3662_s7, 16, %s536_s20, [#allocation11]  }
 0x132   : > { %s2786_s2 = scalar_lea.hbm %s3664_s9, 4096 }
 0x133   : > { %p2787_p4 = scmp.ne.s32.totalorder %s3664_s9, %s2786_s2  ;;  %p2793_p6 = scmp.lt.u32.totalorder %s2786_s2, %s3664_s9 }
 0x135   : > { %p2789_p2 = pnand %p2787_p4, %p3154_p7 }
 0x137   : > { %p2790_p3 = pneg %p2789_p2 }
 0x139   : > { %p2795_p8 = pnand %p2793_p6, %p2790_p3 }
 0x13b   : > { %2798 = shalt.err (!%p2795_p8)
}
 0x13c   : > { %s2799_s27 = scalar_lea.vmem %s557_s0, 4096  ;;  %p2807_p12 = scmp.lt.s32.totalorder %s557_s0, %s557_s0 }
 0x13d   : > { %p2800_p9 = scmp.ne.s32.totalorder %s557_s0, %s2799_s27  ;;  %p2808_p13 = scmp.lt.s32.totalorder %s2799_s27, %s2799_s27 }
 0x13f   : > { %p2802_p10 = pnand %p2800_p9, %p3154_p7  ;;  %p2809_p0 = por %p2808_p13, %p2807_p12 }
 0x141   : > { %p2803_p11 = pneg %p2802_p10 }
 0x143   : > { %p2810_p1 = pnand %p2809_p0, %p2803_p11 }
 0x145   : > { %2813 = shalt.err (!%p2810_p1)
}
 0x146   : > { %s3000_s20 = smov 256   ;;  %s3001_s30 = smov 16  }
 0x147   : > { %2350 = dma.hbm_to_vmem [thread:$0]  (!%p3138_p5), %s3664_s9, 4096, %s557_s0, [#allocation14], %s3000_s20, %s3000_s20, %s3001_s30  }
 0x148   : > { %s3002_s26 = smov [#allocation18]   ;;  %s3003_s22 = smov [#allocation21]  }
 0x149   : > { %s581_s3 = sshll.u32 %s3002_s26, 4  ;;  %s602_s6 = sshll.u32 %s3003_s22, 4  ;;  %s582_s3 = int_to_ptr.vmem [resolvable:$true] %s581_s3  ;;  %s603_s6 = int_to_ptr.vmem [resolvable:$true] %s602_s6 }
 0x14a   : > { %s2814_s17 = scalar_lea.hbm %s3666_s11, 32 }
 0x14b   : > { %p2815_p4 = scmp.ne.s32.totalorder %s3666_s11, %s2814_s17  ;;  %p2821_p6 = scmp.lt.u32.totalorder %s2814_s17, %s3666_s11 }
 0x14d   : > { %p2817_p2 = pnand %p2815_p4, %p3154_p7 }
 0x14f   : > { %p2818_p3 = pneg %p2817_p2 }
 0x151   : > { %p2823_p8 = pnand %p2821_p6, %p2818_p3 }
 0x153   : > { %2826 = shalt.err (!%p2823_p8)
}
 0x154   : > { %s2827_s0 = scalar_lea.vmem %s582_s3, 32  ;;  %p2835_p12 = scmp.lt.s32.totalorder %s582_s3, %s582_s3 }
 0x155   : > { %p2828_p9 = scmp.ne.s32.totalorder %s582_s3, %s2827_s0  ;;  %p2836_p13 = scmp.lt.s32.totalorder %s2827_s0, %s2827_s0 }
 0x157   : > { %p2830_p10 = pnand %p2828_p9, %p3154_p7  ;;  %p2837_p0 = por %p2836_p13, %p2835_p12 }
 0x159   : > { %p2831_p11 = pneg %p2830_p10 }
 0x15b   : > { %p2838_p1 = pnand %p2837_p0, %p2831_p11 }
 0x15d   : > { %2841 = shalt.err (!%p2838_p1)
}
 0x15e   : > { %2356 = dma.hbm_to_vmem [thread:$0]  (!%p3138_p5), %s3666_s11, 32, %s582_s3, [#allocation17]  }
 0x15f   : > { %s2842_s26 = scalar_lea.hbm %s3668_s13, 16384 }
 0x160   : > { %p2843_p4 = scmp.ne.s32.totalorder %s3668_s13, %s2842_s26  ;;  %p2849_p6 = scmp.lt.u32.totalorder %s2842_s26, %s3668_s13 }
 0x162   : > { %p2845_p2 = pnand %p2843_p4, %p3154_p7 }
 0x164   : > { %p2846_p3 = pneg %p2845_p2 }
 0x166   : > { %p2851_p8 = pnand %p2849_p6, %p2846_p3 }
 0x168   : > { %2854 = shalt.err (!%p2851_p8)
}
 0x169   : > { %s2855_s4 = scalar_lea.vmem %s603_s6, 16384  ;;  %p2863_p12 = scmp.lt.s32.totalorder %s603_s6, %s603_s6 }
 0x16a   : > { %p2856_p9 = scmp.ne.s32.totalorder %s603_s6, %s2855_s4  ;;  %p2864_p13 = scmp.lt.s32.totalorder %s2855_s4, %s2855_s4 }
 0x16c   : > { %p2858_p10 = pnand %p2856_p9, %p3154_p7  ;;  %p2865_p0 = por %p2864_p13, %p2863_p12 }
 0x16e   : > { %p2859_p11 = pneg %p2858_p10 }
 0x170   : > { %p2866_p1 = pnand %p2865_p0, %p2859_p11 }
 0x172   : > { %2869 = shalt.err (!%p2866_p1)
}
 0x173   : > { %s3004_s3 = smov 512   ;;  %s3005_s18 = smov 32  }
 0x174   : > { %2362 = dma.hbm_to_vmem [thread:$0]  (!%p3138_p5), %s3668_s13, 16384, %s603_s6, [#allocation20], %s3004_s3, %s3004_s3, %s3005_s18  }
 0x175   : > { %s3006_s0 = smov [#allocation24]   ;;  %s3007_s30 = smov [#allocation25]  }
 0x176   : > { %s627_s20 = sshll.u32 %s3006_s0, 4  ;;  %s638_s29 = sshll.u32 %s3007_s30, 4  ;;  %s628_s20 = int_to_ptr.vmem [resolvable:$true] %s627_s20  ;;  %s639_s29 = int_to_ptr.vmem [resolvable:$true] %s638_s29 }
 0x177   : > { %s2870_s22 = scalar_lea.hbm %s3670_s15, 64 }
 0x178   : > { %p2871_p4 = scmp.ne.s32.totalorder %s3670_s15, %s2870_s22  ;;  %p2877_p6 = scmp.lt.u32.totalorder %s2870_s22, %s3670_s15 }
 0x17a   : > { %p2873_p2 = pnand %p2871_p4, %p3154_p7 }
 0x17c   : > { %p2874_p3 = pneg %p2873_p2 }
 0x17e   : > { %p2879_p8 = pnand %p2877_p6, %p2874_p3 }
 0x180   : > { %2882 = shalt.err (!%p2879_p8)
}
 0x181   : > { %s2883_s6 = scalar_lea.vmem %s628_s20, 64  ;;  %p2891_p12 = scmp.lt.s32.totalorder %s628_s20, %s628_s20 }
 0x182   : > { %p2884_p9 = scmp.ne.s32.totalorder %s628_s20, %s2883_s6  ;;  %p2892_p13 = scmp.lt.s32.totalorder %s2883_s6, %s2883_s6 }
 0x184   : > { %p2886_p10 = pnand %p2884_p9, %p3154_p7  ;;  %p2893_p0 = por %p2892_p13, %p2891_p12 }
 0x186   : > { %p2887_p11 = pneg %p2886_p10 }
 0x188   : > { %p2894_p1 = pnand %p2893_p0, %p2887_p11 }
 0x18a   : > { %2897 = shalt.err (!%p2894_p1)
}
 0x18b   : > { %2368 = dma.hbm_to_vmem [thread:$0]  (!%p3138_p5), %s3670_s15, 64, %s628_s20, [#allocation23]  }
 0x18c   : > { %s2898_s0 = scalar_lea.hbm %s3671_s16, 64 }
 0x18d   : > { %p2899_p4 = scmp.ne.s32.totalorder %s3671_s16, %s2898_s0  ;;  %p2905_p6 = scmp.lt.u32.totalorder %s2898_s0, %s3671_s16 }
 0x18f   : > { %p2901_p2 = pnand %p2899_p4, %p3154_p7 }
 0x191   : > { %p2902_p3 = pneg %p2901_p2 }
 0x193   : > { %p2907_p8 = pnand %p2905_p6, %p2902_p3 }
 0x195   : > { %2910 = shalt.err (!%p2907_p8)
}
 0x196   : > { %s2911_s8 = scalar_lea.vmem %s639_s29, 64  ;;  %p2919_p12 = scmp.lt.s32.totalorder %s639_s29, %s639_s29 }
 0x197   : > { %p2912_p9 = scmp.ne.s32.totalorder %s639_s29, %s2911_s8  ;;  %p2920_p13 = scmp.lt.s32.totalorder %s2911_s8, %s2911_s8 }
 0x199   : > { %p2914_p10 = pnand %p2912_p9, %p3154_p7  ;;  %p2921_p0 = por %p2920_p13, %p2919_p12 }
 0x19b   : > { %p2915_p11 = pneg %p2914_p10 }
 0x19d   : > { %p2922_p1 = pnand %p2921_p0, %p2915_p11 }
 0x19f   : > { %2925 = shalt.err (!%p2922_p1)
}
 0x1a0   : > { %2371 = dma.hbm_to_vmem [thread:$0]  (!%p3138_p5), %s3671_s16, 64, %s639_s29, [#allocation26]  }
 0x1a1   : > { %s3705_s17 = sld [smem:[#allocation39_spill]] }
 0x1a7   : > { %p3706_p4 = scmp.ne.s32.totalorder %s3705_s17, 0 }
 0x1a8   : > { %s3707_s4 = sld [smem:[#allocation38_spill]] (!%p3706_p4) }
 0x1a9   : > { %666 = sbr.rel (%p3706_p4) target bundleno = 1978 (0x7ba), region = 88 }
 0x1ae   : > { %p3708_p2 = scmp.ne.s32.totalorder (!%p3706_p4), %s3707_s4, 0 }
 0x1b0   : > { %2939 = dma.done.wait (%p3708_p2), [#allocation3], 64  }
 0x1b1   : > { %2941 = vsyncadd (%p3708_p2), [#allocation3], 4294967232 }
 0x1b2   : > { %2943 = dma.done.wait (%p3708_p2), [#allocation5], 32  }
 0x1b3   : > { %2945 = vsyncadd (%p3708_p2), [#allocation5], 4294967264 }
 0x1b4   : > { %2947 = dma.done.wait (%p3708_p2), [#allocation8], 1040  }
 0x1b5   : > { %2949 = vsyncadd (%p3708_p2), [#allocation8], 4294966256 }
 0x1b6   : > { %2951 = dma.done.wait (%p3708_p2), [#allocation11], 32  }
 0x1b7   : > { %2953 = vsyncadd (%p3708_p2), [#allocation11], 4294967264 }
 0x1b8   : > { %2955 = dma.done.wait (%p3708_p2), [#allocation14], 4112  }
 0x1b9   : > { %2957 = vsyncadd (%p3708_p2), [#allocation14], 4294963184 }
 0x1ba   : > { %2959 = dma.done.wait (%p3708_p2), [#allocation17], 64  }
 0x1bb   : > { %2961 = vsyncadd (%p3708_p2), [#allocation17], 4294967232 }
 0x1bc   : > { %2963 = dma.done.wait (%p3708_p2), [#allocation20], 16416  }
 0x1bd   : > { %2965 = vsyncadd (%p3708_p2), [#allocation20], 4294950880 }
 0x1be   : > { %2967 = dma.done.wait (%p3708_p2), [#allocation23], 128  }
 0x1bf   : > { %2969 = vsyncadd (%p3708_p2), [#allocation23], 4294967168 }
 0x1c0   : > { %2971 = dma.done.wait (%p3708_p2), [#allocation26], 64  }
 0x1c1   : > { %2973 = vsyncadd (%p3708_p2), [#allocation26], 4294967232  ;;  %s3709_s21 = sld [smem:[#allocation36_spill]]  ;;  %v3008_v0 = vmov 0   ;;  %v819_v1 = vlaneseq  ;;  %s3712_s18 = sld [smem:[#allocation40_spill]]  ;;  %v3009_v3 = vmov -inf  }
 0x1c2   : > { %2458 = vset.pattern.permute.xlu1 %v3008_v0  ;;  %2456 = vset.pattern.permute.xlu0 %v3008_v0  ;;  %s3713_s30 = sld [smem:[#allocation47_spill]]  ;;  %v3010_v6 = vmov 1   ;;  %v3011_v7 = vmov 2   ;;  %v808_v13 = vld [vmem:[#allocation2] sm:$0x7]  ;;  %vm868_vm1 = vcmask 523264  }
 0x1c3   : > { %vm3507_vm0 = vcmp.lt.s32.totalorder %v819_v1, 512  ;;  %v3522_v8 = vshrl.u32 %v819_v1, 7  ;;  %v2043_v30 = vld [vmem:[#allocation4] ss:$0 sm:$0xff]  ;;  %v919_v41 = vld [vmem:[#allocation9] sm:$0xff]  ;;  %v920_v42 = vld [vmem:[#allocation9 + $0x8] sm:$0xff] }
 0x1c4   : > { %v921_v43 = vld [vmem:[#allocation9 + $0x10] sm:$0xff]  ;;  %v2083_v44 = vpack.c.bf16 %v920_v42, %v919_v41  ;;  %v922_v45 = vld [vmem:[#allocation9 + $0x18] sm:$0xff]  ;;  %v923_v47 = vld [vmem:[#allocation9 + $0x20] sm:$0xff] }
 0x1c5   : > { %v3525_v9 = vsub.s32 1, %v3522_v8  ;;  %v3528_v12 = vsub.s32 0, %v3522_v8  ;;  %v3532_v15 = vsub.s32 2, %v3522_v8  ;;  %v2087_v46 = vpack.c.bf16 %v922_v45, %v921_v43  ;;  %v924_v48 = vld [vmem:[#allocation9 + $0x28] sm:$0xff]  ;;  %v925_v50 = vld [vmem:[#allocation9 + $0x30] sm:$0xff]  ;;  %v926_v51 = vld [vmem:[#allocation9 + $0x38] sm:$0xff] }
 0x1c6   : > { %2084 = vmatprep.subr.bf16.mxu0 %v2083_v44  ;;  %v2091_v49 = vpack.c.bf16 %v924_v48, %v923_v47  ;;  %v2095_v52 = vpack.c.bf16 %v926_v51, %v925_v50  ;;  %v1069_v41 = vld [vmem:[#allocation15 + $0x30] sm:$0xff]  ;;  %v1072_v43 = vld [vmem:[#allocation15 + $0x48] sm:$0xff]  ;;  %v1078_v50 = vld [vmem:[#allocation15 + $0x78] sm:$0xff] }
 0x1c7   : > { %p788_p5 = scmp.lt.s32.totalorder %s3709_s21, 1  ;;  %v836_v14 = vrot.slane %v808_v13, %v3525_v9  ;;  %v822_v16 = vrot.slane %v808_v13, %v3528_v12  ;;  %v852_v21 = vrot.slane %v808_v13, %v3532_v15  ;;  %2086 = vmatpush3.bf16.msra.mxu0 %v2083_v44  ;;  %v1074_v44 = vld [vmem:[#allocation15 + $0x58] sm:$0xff]  ;;  %v1073_v47 = vld [vmem:[#allocation15 + $0x50] sm:$0xff] }
 0x1c8   : > { %2088 = vmatprep.subr.bf16.mxu0 %v2087_v46  ;;  %v2107_v45 = vpack.c.bf16 %v1074_v44, %v1072_v43  ;;  %v2050_v43 = vld [vmem:[#allocation13] ss:$0 sm:$0xff] }
 0x1c9   : > { %s3720_s21 = smov (!%p788_p5, %s3709_s21), 1 }
 0x1ca   : > { %s2053_s1 = sshll.u32 %s3720_s21, 4  ;;  %s2042_s29 = sshll.u32 %s3720_s21, 2 }
 0x1cb   : > { %s795_s24 = scalar_lea.vmem %s3712_s18, %s2053_s1  ;;  %s3517_s19 = scalar_lea.vmem %s3713_s30, %s2042_s29  ;;  %2090 = vmatpush3.bf16.msra.mxu0 %v2087_v46  ;;  %v1071_v46 = vld [vmem:[#allocation15 + $0x40] sm:$0xff] }
 0x1cc   : > { %1724 = vst.msk [vmem:[%s3517_s19] sm:$0xf] %vm3507_vm0, %v3009_v3  ;;  %v807_v4 = vld [vmem:[%s795_s24 + $0x8] sm:$0xff]  ;;  %v806_v5 = vld [vmem:[%s795_s24] sm:$0xff]  ;;  %2092 = vmatprep.subr.bf16.mxu0 %v2091_v49  ;;  %v2109_v48 = vpack.c.bf16 %v1073_v47, %v1071_v46 }
 0x1cd   : > { %816 = vperm.xlu1 %2458, %v807_v4   ;;  %811 = vperm.xlu0 %2456, %v806_v5  }
 0x1cf   : > { %2094 = vmatpush3.bf16.msra.mxu0 %v2091_v49  ;;  %v1076_v49 = vld [vmem:[#allocation15 + $0x68] sm:$0xff] }
 0x1d0   : > { %2096 = vmatprep.subr.bf16.mxu0 %v2095_v52  ;;  %v2111_v51 = vpack.c.bf16 %v1078_v50, %v1076_v49 }
 0x1d1   : > { %2459 = vset.pattern.permute.xlu1 %v3010_v6  ;;  %2457 = vset.pattern.permute.xlu0 %v3010_v6 }
 0x1d2   : > { %830 = vperm.xlu1 %2459, %v807_v4   ;;  %826 = vperm.xlu0 %2457, %v806_v5  }
 0x1d3   : > { %2098 = vmatpush3.bf16.msra.mxu0 %v2095_v52  ;;  %v1075_v52 = vld [vmem:[#allocation15 + $0x60] sm:$0xff] }
 0x1d6   : > { %2460 = vset.pattern.permute.xlu1 %v3011_v7  ;;  %2461 = vset.pattern.permute.xlu0 %v3011_v7 }
 0x1d7   : > { %842 = vperm.xlu1 %2460, %v806_v5   ;;  %846 = vperm.xlu0 %2461, %v807_v4  }
 0x24c   : > { %v817_v10 = vpop.permute.xlu1 %816  ;;  %v812_v11 = vpop.permute.xlu0 %811 }
 0x24d   : > { %v824_v22 = vmul.f32 %v822_v16, %v817_v10  ;;  %v823_v23 = vmul.f32 %v822_v16, %v812_v11  ;;  %v2044_v11 = vld [vmem:[#allocation6] ss:$0 sm:$0xff]  ;;  %v2045_v16 = vld [vmem:[#allocation7] ss:$0 sm:$0xff] }
 0x251   : > { %v831_v17 = vpop.permute.xlu1 %830  ;;  %v827_v18 = vpop.permute.xlu0 %826 }
 0x252   : > { %v838_v19 = vmul.f32 %v836_v14, %v831_v17  ;;  %v837_v20 = vmul.f32 %v836_v14, %v827_v18 }
 0x254   : > { %v840_v26 = vadd.f32 %v838_v19, %v824_v22  ;;  %v839_v27 = vadd.f32 %v837_v20, %v823_v23 }
 0x256   : > { %v843_v24 = vpop.permute.xlu1 %842  ;;  %v847_v25 = vpop.permute.xlu0 %846 }
 0x257   : > { %v853_v28 = vmul.f32 %v852_v21, %v843_v24  ;;  %v854_v29 = vmul.f32 %v852_v21, %v847_v25  ;;  %v1064_v24 = vld [vmem:[#allocation15 + $0x8] sm:$0xff]  ;;  %v1066_v25 = vld [vmem:[#allocation15 + $0x18] sm:$0xff] }
 0x259   : > { %v855_v31 = vadd.f32 %v853_v28, %v839_v27  ;;  %v856_v32 = vadd.f32 %v854_v29, %v840_v26  ;;  %v1063_v26 = vld [vmem:[#allocation15] sm:$0xff]  ;;  %v2099_v27 = vpack.c.bf16 %v1066_v25, %v1064_v24  ;;  %v1065_v28 = vld [vmem:[#allocation15 + $0x10] sm:$0xff] }
 0x25a   : > { %v2101_v29 = vpack.c.bf16 %v1065_v28, %v1063_v26 }
 0x25b   : > { %v864_v33 = vadd.f32 %v2043_v30, %v855_v31  ;;  %v865_v34 = vadd.f32 %v2043_v30, %v856_v32  ;;  %2100 = vmatprep.subr.bf16.mxu1 %v2099_v27  ;;  %v2046_v30 = vld [vmem:[#allocation10] ss:$0 sm:$0xff] }
 0x25c   : > { %2102 = vmatpush1.bf16.msra.mxu1 %v2101_v29 }
 0x25d   : > { %v869_v35 = vsel %vm868_vm1, %v864_v33, 0.0  ;;  %v872_v36 = vsel %vm868_vm1, %v865_v34, 0.0  ;;  %v875_v37 = vmul.f32 %v864_v33, %v864_v33  ;;  %v876_v38 = vmul.f32 %v865_v34, %v865_v34 }
 0x25e   : > { %870 = vadd.xlane.f32.xlu1 %v869_v35  ;;  %873 = vadd.xlane.f32.xlu0 %v872_v36 }
 0x25f   : > { %v877_v39 = vsel %vm868_vm1, %v875_v37, 0.0  ;;  %v880_v40 = vsel %vm868_vm1, %v876_v38, 0.0  ;;  %v1068_v37 = vld [vmem:[#allocation15 + $0x28] sm:$0xff]  ;;  %v1070_v38 = vld [vmem:[#allocation15 + $0x38] sm:$0xff] }
 0x262   : > { %878 = vadd.xlane.f32.xlu1 %v877_v39  ;;  %881 = vadd.xlane.f32.xlu0 %v880_v40  ;;  %v2103_v39 = vpack.c.bf16 %v1070_v38, %v1068_v37  ;;  %v1067_v40 = vld [vmem:[#allocation15 + $0x20] sm:$0xff] }
 0x263   : > { %v2105_v42 = vpack.c.bf16 %v1069_v41, %v1067_v40  ;;  %v2049_v41 = vld [vmem:[#allocation12] ss:$0 sm:$0xff] }
 0x264   : > { %2104 = vmatprep.subr.bf16.mxu1 %v2103_v39 }
 0x265   : > { %2106 = vmatpush1.bf16.msra.mxu1 %v2105_v42 }
 0x266   : > { %2108 = vmatprep.subr.bf16.mxu1 %v2107_v45 }
 0x269   : > { %2110 = vmatpush1.bf16.msra.mxu1 %v2109_v48 }
 0x26a   : > { %2112 = vmatprep.subr.bf16.mxu1 %v2111_v51 }
 0x2eb   : > { %v871_v53 = vpop.xlane.xlu1 %870  ;;  %v874_v54 = vpop.xlane.xlu0 %873 }
 0x2ec   : > { %v883_v55 = vmul.f32 0.015625, %v871_v53  ;;  %v884_v56 = vmul.f32 0.015625, %v874_v54  ;;  %v1077_v53 = vld [vmem:[#allocation15 + $0x70] sm:$0xff] }
 0x2ed   : > { %v2113_v54 = vpack.c.bf16 %v1077_v53, %v1075_v52  ;;  %v1259_v53 = vld [vmem:[#allocation21 + $0x8] sm:$0xff] }
 0x2ee   : > { %v887_v59 = vmul.f32 %v883_v55, %v883_v55  ;;  %v888_v60 = vmul.f32 %v884_v56, %v884_v56  ;;  %v897_v6 = vsub.f32 %v864_v33, %v883_v55  ;;  %v898_v10 = vsub.f32 %v865_v34, %v884_v56  ;;  %v1080_v55 = vld [vmem:[#allocation15 + $0x88] sm:$0xff]  ;;  %v1082_v56 = vld [vmem:[#allocation15 + $0x98] sm:$0xff] }
 0x2ef   : > { %v879_v57 = vpop.xlane.xlu1 %878  ;;  %v882_v58 = vpop.xlane.xlu0 %881  ;;  %2114 = vmatpush1.bf16.msra.mxu1 %v2113_v54  ;;  %v1263_v54 = vld [vmem:[#allocation21 + $0x28] sm:$0xff] }
 0x2f0   : > { %v885_v61 = vmul.f32 0.015625, %v879_v57  ;;  %v886_v62 = vmul.f32 0.015625, %v882_v58  ;;  %v2115_v57 = vpack.c.bf16 %v1082_v56, %v1080_v55  ;;  %v1079_v58 = vld [vmem:[#allocation15 + $0x80] sm:$0xff]  ;;  %v2131_v55 = vpack.c.bf16 %v1263_v54, %v1259_v53  ;;  %v1303_v53 = vld [vmem:[#allocation21 + $0x168] sm:$0xff] }
 0x2f1   : > { %v1265_v56 = vld [vmem:[#allocation21 + $0x38] sm:$0xff] }
 0x2f2   : > { %v889_v63 = vsub.f32 %v885_v61, %v887_v59  ;;  %v890_v0 = vsub.f32 %v886_v62, %v888_v60  ;;  %v1081_v59 = vld [vmem:[#allocation15 + $0x90] sm:$0xff]  ;;  %2116 = vmatprep.subr.bf16.mxu1 %v2115_v57  ;;  %v1084_v61 = vld [vmem:[#allocation15 + $0xa8] sm:$0xff]  ;;  %v1086_v62 = vld [vmem:[#allocation15 + $0xb8] sm:$0xff]  ;;  %2132 = vmatprep.subr.bf16.mxu0 %v2131_v55 }
 0x2f3   : > { %v2117_v60 = vpack.c.bf16 %v1081_v59, %v1079_v58  ;;  %v1258_v57 = vld [vmem:[#allocation21] sm:$0xff]  ;;  %v1301_v54 = vld [vmem:[#allocation21 + $0x158] sm:$0xff] }
 0x2f4   : > { %v891_v1 = vmax.f32 %v889_v63, 0.0  ;;  %v892_v3 = vmax.f32 %v890_v0, 0.0  ;;  %v1083_v63 = vld [vmem:[#allocation15 + $0xa0] sm:$0xff]  ;;  %v2119_v0 = vpack.c.bf16 %v1086_v62, %v1084_v61  ;;  %v1264_v61 = vld [vmem:[#allocation21 + $0x30] sm:$0xff]  ;;  %v1267_v62 = vld [vmem:[#allocation21 + $0x48] sm:$0xff] }
 0x2f5   : > { %2118 = vmatpush1.bf16.msra.mxu1 %v2117_v60  ;;  %v1262_v58 = vld [vmem:[#allocation21 + $0x20] sm:$0xff]  ;;  %v1260_v60 = vld [vmem:[#allocation21 + $0x10] sm:$0xff] }
 0x2f6   : > { %v893_v4 = vadd.f32 1e-05, %v891_v1  ;;  %v894_v5 = vadd.f32 1e-05, %v892_v3  ;;  %v1085_v1 = vld [vmem:[#allocation15 + $0xb0] sm:$0xff]  ;;  %v1088_v3 = vld [vmem:[#allocation15 + $0xc8] sm:$0xff]  ;;  %2120 = vmatprep.subr.bf16.mxu1 %v2119_v0 }
 0x2f7   : > { %v1271_v0 = vld [vmem:[#allocation21 + $0x68] sm:$0xff] }
 0x2f8   : > { %2462 = vrsqrt.f32 %v893_v4  ;;  %v1090_v4 = vld [vmem:[#allocation15 + $0xd8] sm:$0xff] }
 0x2f9   : > { %2464 = vrsqrt.f32 %v894_v5  ;;  %v3012_v5 = vmov 0.0  }
 0x2fa   : > { %1171 = vmatprep.mubr.f32.mxu1 %v3012_v5 }
 0x302   : > { %v2463_v7 = vpop.eup %2462 }
 0x303   : > { %v2465_v13 = vpop.eup %2464  ;;  %v899_v14 = vmul.f32 %v2463_v7, %v897_v6  ;;  %v2121_v6 = vpack.c.bf16 %v1085_v1, %v1083_v63  ;;  %v2123_v7 = vpack.c.bf16 %v1090_v4, %v1088_v3  ;;  %v2197_v63 = vpack.c.bf16 %v1264_v61, %v1260_v60  ;;  %v1269_v1 = vld [vmem:[#allocation21 + $0x58] sm:$0xff]  ;;  %v1304_v61 = vld [vmem:[#allocation21 + $0x170] sm:$0xff] }
 0x304   : > { %v900_v17 = vmul.f32 %v2465_v13, %v898_v10  ;;  %v1087_v10 = vld [vmem:[#allocation15 + $0xc0] sm:$0xff]  ;;  %v1092_v13 = vld [vmem:[#allocation15 + $0xe8] sm:$0xff]  ;;  %v2135_v4 = vpack.c.bf16 %v1271_v0, %v1267_v62 }
 0x305   : > { %v907_v18 = vmul.f32 %v2044_v11, %v899_v14  ;;  %v1094_v14 = vld [vmem:[#allocation15 + $0xf8] sm:$0xff]  ;;  %2122 = vmatpush1.bf16.msra.mxu1 %v2121_v6  ;;  %v1266_v6 = vld [vmem:[#allocation21 + $0x40] sm:$0xff]  ;;  %v1307_v62 = vld [vmem:[#allocation21 + $0x188] sm:$0xff] }
 0x306   : > { %v908_v19 = vmul.f32 %v2044_v11, %v900_v17  ;;  %v1089_v11 = vld [vmem:[#allocation15 + $0xd0] sm:$0xff]  ;;  %2124 = vmatprep.subr.bf16.mxu1 %v2123_v7  ;;  %v2127_v17 = vpack.c.bf16 %v1094_v14, %v1092_v13  ;;  %v1273_v3 = vld [vmem:[#allocation21 + $0x78] sm:$0xff]  ;;  %v1270_v7 = vld [vmem:[#allocation21 + $0x60] sm:$0xff] }
 0x307   : > { %v915_v20 = vadd.f32 %v2045_v16, %v907_v18  ;;  %v1091_v18 = vld [vmem:[#allocation15 + $0xe0] sm:$0xff]  ;;  %v1272_v13 = vld [vmem:[#allocation21 + $0x70] sm:$0xff]  ;;  %v1275_v14 = vld [vmem:[#allocation21 + $0x88] sm:$0xff] }
 0x308   : > { %v916_v21 = vadd.f32 %v2045_v16, %v908_v19  ;;  %v2125_v16 = vpack.c.bf16 %v1089_v11, %v1087_v10  ;;  %v1093_v19 = vld [vmem:[#allocation15 + $0xf0] sm:$0xff]  ;;  %v2137_v11 = vpack.c.bf16 %v1270_v7, %v1266_v6  ;;  %v1309_v0 = vld [vmem:[#allocation21 + $0x198] sm:$0xff]  ;;  %v1306_v6 = vld [vmem:[#allocation21 + $0x180] sm:$0xff] }
 0x309   : > { %v917_v22 = vmax.f32 %v915_v20, 0.0  ;;  %v2129_v20 = vpack.c.bf16 %v1093_v19, %v1091_v18  ;;  %v1268_v10 = vld [vmem:[#allocation21 + $0x50] sm:$0xff]  ;;  %v1277_v19 = vld [vmem:[#allocation21 + $0x98] sm:$0xff]  ;;  %v1310_v7 = vld [vmem:[#allocation21 + $0x1a0] sm:$0xff] }
 0x30a   : > { %v918_v23 = vmax.f32 %v916_v21, 0.0  ;;  %2126 = vmatpush1.bf16.msra.mxu1 %v2125_v16  ;;  %v1279_v16 = vld [vmem:[#allocation21 + $0xa8] sm:$0xff] }
 0x30b   : > { %2080 = vmatprep.mubr.msk.f32.mxu0 %vm868_vm1, %v917_v22  ;;  %2128 = vmatprep.subr.bf16.mxu1 %v2127_v17  ;;  %v2201_v17 = vpack.c.bf16 %v1272_v13, %v1268_v10  ;;  %v2139_v18 = vpack.c.bf16 %v1279_v16, %v1275_v14  ;;  %v1308_v10 = vld [vmem:[#allocation21 + $0x190] sm:$0xff]  ;;  %v1315_v14 = vld [vmem:[#allocation21 + $0x1c8] sm:$0xff] }
 0x30c   : > { %2081 = vmatmul.mubr.msk.f32.vlgmr.msra.gmra.mrb[0].mxu0 %vm868_vm1, %v918_v23  ;;  %v1312_v13 = vld [vmem:[#allocation21 + $0x1b0] sm:$0xff]  ;;  %v1319_v16 = vld [vmem:[#allocation21 + $0x1e8] sm:$0xff] }
 0x30e   : > { %2130 = vmatpush1.bf16.msra.mxu1 %v2129_v20  ;;  %v1281_v20 = vld [vmem:[#allocation21 + $0xb8] sm:$0xff] }
 0x3df   : > { %v2082_v31 = vpop.f32.mrb[0].mxu0 }
 0x3e0   : > { %v1006_v32 = vpop.f32.mrb[1].mxu0  ;;  %v3544_v34 = vadd.f32 %v2082_v31, %v2046_v30 }
 0x3e1   : > { %v3542_v33 = vadd.f32 %v2046_v30, %v1006_v32 }
 0x3e2   : > { %v1022_v36 = vmul.f32 %v3544_v34, %v3544_v34 }
 0x3e3   : > { %1017 = vadd.xlane.f32.xlu1 %v3542_v33  ;;  %v1021_v35 = vmul.f32 %v3542_v33, %v3542_v33 }
 0x3e5   : > { %1023 = vadd.xlane.f32.xlu0 %v1021_v35 }
 0x3e7   : > { %1019 = vadd.xlane.f32.xlu1 %v3544_v34 }
 0x3e9   : > { %1025 = vadd.xlane.f32.xlu0 %v1022_v36 }
 0x470   : > { %v1018_v21 = vpop.xlane.xlu1 %1017 }
 0x471   : > { %v1027_v22 = vmul.f32 0.0078125, %v1018_v21  ;;  %v1274_v21 = vld [vmem:[#allocation21 + $0x80] sm:$0xff] }
 0x472   : > { %v1024_v23 = vpop.xlane.xlu0 %1023 }
 0x473   : > { %v1031_v24 = vmul.f32 %v1027_v22, %v1027_v22  ;;  %v1029_v25 = vmul.f32 0.0078125, %v1024_v23  ;;  %v1041_v39 = vsub.f32 %v3542_v33, %v1027_v22  ;;  %v1261_v33 = vld [vmem:[#allocation21 + $0x18] sm:$0xff]  ;;  %v2203_v22 = vpack.c.bf16 %v1281_v20, %v1277_v19  ;;  %v1278_v23 = vld [vmem:[#allocation21 + $0xa0] sm:$0xff] }
 0x474   : > { %v1020_v26 = vpop.xlane.xlu1 %1019  ;;  %v2195_v59 = vpack.c.bf16 %v1265_v56, %v1261_v33  ;;  %v1305_v33 = vld [vmem:[#allocation21 + $0x178] sm:$0xff]  ;;  %v2157_v19 = vpack.c.bf16 %v1310_v7, %v1306_v6  ;;  %v2221_v20 = vpack.c.bf16 %v1312_v13, %v1308_v10  ;;  %v1332_v6 = vld [vmem:[#allocation21 + $0x250] sm:$0xff]  ;;  %v1343_v13 = vld [vmem:[#allocation21 + $0x2a8] sm:$0xff] }
 0x475   : > { %v1033_v27 = vsub.f32 %v1029_v25, %v1031_v24  ;;  %v1028_v28 = vmul.f32 0.0078125, %v1020_v26  ;;  %v1276_v24 = vld [vmem:[#allocation21 + $0x90] sm:$0xff]  ;;  %v2141_v26 = vpack.c.bf16 %v1278_v23, %v1274_v21  ;;  %v2215_v60 = vpack.c.bf16 %v1305_v33, %v1301_v54  ;;  %v1318_v23 = vld [vmem:[#allocation21 + $0x1e0] sm:$0xff] }
 0x476   : > { %v1026_v29 = vpop.xlane.xlu0 %1025  ;;  %2196 = vmatprep.subr.bf16.mxu1 %v2195_v59  ;;  %v1280_v25 = vld [vmem:[#allocation21 + $0xb0] sm:$0xff]  ;;  %v1302_v59 = vld [vmem:[#allocation21 + $0x160] sm:$0xff]  ;;  %v2159_v21 = vpack.c.bf16 %v1319_v16, %v1315_v14  ;;  %v1341_v14 = vld [vmem:[#allocation21 + $0x298] sm:$0xff] }
 0x477   : > { %v1035_v30 = vmax.f32 %v1033_v27, 0.0  ;;  %v1032_v31 = vmul.f32 %v1028_v28, %v1028_v28  ;;  %v1030_v32 = vmul.f32 0.0078125, %v1026_v29  ;;  %v1042_v44 = vsub.f32 %v3544_v34, %v1028_v28  ;;  %v1283_v27 = vld [vmem:[#allocation21 + $0xc8] sm:$0xff]  ;;  %v1285_v29 = vld [vmem:[#allocation21 + $0xd8] sm:$0xff]  ;;  %v1336_v7 = vld [vmem:[#allocation21 + $0x270] sm:$0xff] }
 0x478   : > { %v2133_v34 = vpack.c.bf16 %v1262_v58, %v1258_v57  ;;  %v1287_v28 = vld [vmem:[#allocation21 + $0xe8] sm:$0xff]  ;;  %v1298_v58 = vld [vmem:[#allocation21 + $0x140] sm:$0xff]  ;;  %v2233_v10 = vpack.c.bf16 %v1336_v7, %v1332_v6 }
 0x479   : > { %v1037_v35 = vadd.f32 1e-05, %v1035_v30  ;;  %v1034_v36 = vsub.f32 %v1030_v32, %v1032_v31  ;;  %v2205_v30 = vpack.c.bf16 %v1280_v25, %v1276_v24  ;;  %v2143_v31 = vpack.c.bf16 %v1287_v28, %v1283_v27  ;;  %v1289_v32 = vld [vmem:[#allocation21 + $0xf8] sm:$0xff]  ;;  %v1316_v24 = vld [vmem:[#allocation21 + $0x1d0] sm:$0xff]  ;;  %v1323_v27 = vld [vmem:[#allocation21 + $0x208] sm:$0xff] }
 0x47a   : > { %2134 = vmatpush1.bf16.msra.mxu0 %v2133_v34  ;;  %v1300_v34 = vld [vmem:[#allocation21 + $0x150] sm:$0xff]  ;;  %v1327_v28 = vld [vmem:[#allocation21 + $0x228] sm:$0xff] }
 0x47b   : > { %2466 = vrsqrt.f32 %v1037_v35  ;;  %v1036_v37 = vmax.f32 %v1034_v36, 0.0  ;;  %2136 = vmatprep.subr.bf16.mxu0 %v2135_v4  ;;  %v1282_v35 = vld [vmem:[#allocation21 + $0xc0] sm:$0xff]  ;;  %v2217_v4 = vpack.c.bf16 %v1304_v61, %v1300_v34  ;;  %v1335_v61 = vld [vmem:[#allocation21 + $0x268] sm:$0xff] }
 0x47c   : > { %v1286_v36 = vld [vmem:[#allocation21 + $0xe0] sm:$0xff] }
 0x47d   : > { %v1038_v38 = vadd.f32 1e-05, %v1036_v37  ;;  %v2207_v37 = vpack.c.bf16 %v1289_v32, %v1285_v29  ;;  %v1325_v29 = vld [vmem:[#allocation21 + $0x218] sm:$0xff] }
 0x47e   : > { %2138 = vmatpush1.bf16.msra.mxu0 %v2137_v11 }
 0x47f   : > { %2468 = vrsqrt.f32 %v1038_v38  ;;  %2140 = vmatprep.subr.bf16.mxu0 %v2139_v18  ;;  %v1284_v38 = vld [vmem:[#allocation21 + $0xd0] sm:$0xff]  ;;  %v1321_v18 = vld [vmem:[#allocation21 + $0x1f8] sm:$0xff] }
 0x482   : > { %2142 = vmatpush1.bf16.msra.mxu0 %v2141_v26  ;;  %v1320_v26 = vld [vmem:[#allocation21 + $0x1f0] sm:$0xff] }
 0x483   : > { %2144 = vmatprep.subr.bf16.mxu0 %v2143_v31  ;;  %v2225_v32 = vpack.c.bf16 %v1320_v26, %v1316_v24  ;;  %v1351_v26 = vld [vmem:[#allocation21 + $0x2e8] sm:$0xff] }
 0x485   : > { %v2467_v40 = vpop.eup %2466 }
 0x486   : > { %v1043_v42 = vmul.f32 %v2467_v40, %v1041_v39  ;;  %v1288_v39 = vld [vmem:[#allocation21 + $0xf0] sm:$0xff]  ;;  %v1291_v40 = vld [vmem:[#allocation21 + $0x108] sm:$0xff] }
 0x488   : > { %v1051_v45 = vmul.f32 %v2049_v41, %v1043_v42  ;;  %v1293_v42 = vld [vmem:[#allocation21 + $0x118] sm:$0xff] }
 0x489   : > { %v2469_v46 = vpop.eup %2468 }
 0x48a   : > { %v1059_v47 = vadd.f32 %v2050_v43, %v1051_v45  ;;  %v1044_v48 = vmul.f32 %v2469_v46, %v1042_v44  ;;  %v2145_v44 = vpack.c.bf16 %v1286_v36, %v1282_v35  ;;  %v2209_v45 = vpack.c.bf16 %v1288_v39, %v1284_v38  ;;  %v1322_v36 = vld [vmem:[#allocation21 + $0x200] sm:$0xff]  ;;  %v1324_v39 = vld [vmem:[#allocation21 + $0x210] sm:$0xff] }
 0x48b   : > { %v2163_v35 = vpack.c.bf16 %v1327_v28, %v1323_v27  ;;  %v1349_v27 = vld [vmem:[#allocation21 + $0x2d8] sm:$0xff] }
 0x48c   : > { %v1061_v49 = vmax.f32 %v1059_v47, 0.0  ;;  %v1052_v50 = vmul.f32 %v2049_v41, %v1044_v48  ;;  %v1295_v41 = vld [vmem:[#allocation21 + $0x128] sm:$0xff]  ;;  %v1290_v47 = vld [vmem:[#allocation21 + $0x100] sm:$0xff]  ;;  %2146 = vmatpush1.bf16.msra.mxu0 %v2145_v44 }
 0x48d   : > { %v2147_v46 = vpack.c.bf16 %v1295_v41, %v1291_v40  ;;  %v1294_v48 = vld [vmem:[#allocation21 + $0x120] sm:$0xff]  ;;  %v1328_v40 = vld [vmem:[#allocation21 + $0x230] sm:$0xff] }
 0x48e   : > { %1172 = vmatmul.mubr.f32.vlgmr.msra.gmra.mrb[0].mxu1 %v1061_v49  ;;  %v1060_v51 = vadd.f32 %v2050_v43, %v1052_v50  ;;  %v1297_v43 = vld [vmem:[#allocation21 + $0x138] sm:$0xff]  ;;  %v1292_v49 = vld [vmem:[#allocation21 + $0x110] sm:$0xff]  ;;  %v2149_v55 = vpack.c.bf16 %v1294_v48, %v1290_v47 }
 0x48f   : > { %1177 = vmatprep.mubr.f32.mxu1 %v3012_v5  ;;  %v2199_v5 = vpack.c.bf16 %v1273_v3, %v1269_v1  ;;  %2198 = vmatpush1.bf16.msra.mxu1 %v2197_v63  ;;  %v2211_v50 = vpack.c.bf16 %v1297_v43, %v1293_v42  ;;  %v1311_v63 = vld [vmem:[#allocation21 + $0x1a8] sm:$0xff]  ;;  %v1313_v1 = vld [vmem:[#allocation21 + $0x1b8] sm:$0xff]  ;;  %v2153_v3 = vpack.c.bf16 %v1302_v59, %v1298_v58 }
 0x490   : > { %v1062_v52 = vmax.f32 %v1060_v51, 0.0  ;;  %v1296_v51 = vld [vmem:[#allocation21 + $0x130] sm:$0xff]  ;;  %2148 = vmatprep.subr.bf16.mxu0 %v2147_v46  ;;  %v2219_v11 = vpack.c.bf16 %v1313_v1, %v1309_v0  ;;  %v2229_v42 = vpack.c.bf16 %v1328_v40, %v1324_v39  ;;  %v1095_v43 = vld [vmem:[#allocation16] sm:$0x3]  ;;  %v1330_v1 = vld [vmem:[#allocation21 + $0x240] sm:$0xff] }
 0x491   : > { %2200 = vmatprep.subr.bf16.mxu1 %v2199_v5  ;;  %v2213_v56 = vpack.c.bf16 %v1296_v51, %v1292_v49  ;;  %2150 = vmatpush1.bf16.msra.mxu0 %v2149_v55  ;;  %v2155_v5 = vpack.c.bf16 %v1311_v63, %v1307_v62  ;;  %v1100_v44 = vrot.slane %v1095_v43, %v3528_v12  ;;  %v1333_v62 = vld [vmem:[#allocation21 + $0x258] sm:$0xff]  ;;  %v1355_v39 = vld [vmem:[#allocation21 + $0x308] sm:$0xff] }
 0x492   : > { %1178 = vmatmul.mubr.f32.gmra.mrb[2].mxu1 %v1062_v52  ;;  %v1299_v52 = vld [vmem:[#allocation21 + $0x148] sm:$0xff]  ;;  %v1337_v0 = vld [vmem:[#allocation21 + $0x278] sm:$0xff] }
 0x493   : > { %2202 = vmatpush1.bf16.msra.mxu1 %v2201_v17  ;;  %v2151_v57 = vpack.c.bf16 %v1303_v53, %v1299_v52  ;;  %v1317_v17 = vld [vmem:[#allocation21 + $0x1d8] sm:$0xff]  ;;  %v1359_v40 = vld [vmem:[#allocation21 + $0x328] sm:$0xff] }
 0x494   : > { %2204 = vmatprep.subr.bf16.mxu1 %v2203_v22  ;;  %v1314_v22 = vld [vmem:[#allocation21 + $0x1c0] sm:$0xff]  ;;  %v2223_v25 = vpack.c.bf16 %v1321_v18, %v1317_v17  ;;  %v1345_v17 = vld [vmem:[#allocation21 + $0x2b8] sm:$0xff] }
 0x495   : > { %2152 = vmatprep.subr.bf16.mxu0 %v2151_v57  ;;  %v2161_v31 = vpack.c.bf16 %v1318_v23, %v1314_v22  ;;  %v1338_v18 = vld [vmem:[#allocation21 + $0x280] sm:$0xff]  ;;  %v1340_v22 = vld [vmem:[#allocation21 + $0x290] sm:$0xff] }
 0x496   : > { %2154 = vmatpush1.bf16.msra.mxu0 %v2153_v3  ;;  %v1334_v3 = vld [vmem:[#allocation21 + $0x260] sm:$0xff]  ;;  %v1344_v23 = vld [vmem:[#allocation21 + $0x2b0] sm:$0xff] }
 0x497   : > { %2206 = vmatpush1.bf16.msra.mxu1 %v2205_v30  ;;  %2156 = vmatprep.subr.bf16.mxu0 %v2155_v5  ;;  %v1329_v30 = vld [vmem:[#allocation21 + $0x238] sm:$0xff]  ;;  %v2169_v5 = vpack.c.bf16 %v1334_v3, %v1330_v1  ;;  %v2237_v24 = vpack.c.bf16 %v1344_v23, %v1340_v22  ;;  %v1375_v3 = vld [vmem:[#allocation21 + $0x3a8] sm:$0xff]  ;;  %v1378_v23 = vld [vmem:[#allocation21 + $0x3c0] sm:$0xff] }
 0x498   : > { %2208 = vmatprep.subr.bf16.mxu1 %v2207_v37  ;;  %v1326_v37 = vld [vmem:[#allocation21 + $0x220] sm:$0xff]  ;;  %v2227_v38 = vpack.c.bf16 %v1329_v30, %v1325_v29  ;;  %v1353_v29 = vld [vmem:[#allocation21 + $0x2f8] sm:$0xff] }
 0x499   : > { %v2165_v41 = vpack.c.bf16 %v1326_v37, %v1322_v36  ;;  %v1346_v30 = vld [vmem:[#allocation21 + $0x2c0] sm:$0xff]  ;;  %v1348_v36 = vld [vmem:[#allocation21 + $0x2d0] sm:$0xff]  ;;  %v1385_v22 = vld [vmem:[#allocation21 + $0x3f8] sm:$0xff] }
 0x49a   : > { %2158 = vmatpush1.bf16.msra.mxu0 %v2157_v19  ;;  %v1342_v19 = vld [vmem:[#allocation21 + $0x2a0] sm:$0xff]  ;;  %v1352_v37 = vld [vmem:[#allocation21 + $0x2f0] sm:$0xff] }
 0x49b   : > { %2210 = vmatpush1.bf16.msra.mxu1 %v2209_v45  ;;  %2160 = vmatprep.subr.bf16.mxu0 %v2159_v21  ;;  %v1104_v45 = vrot.slane %v1095_v43, %v3525_v9  ;;  %v2173_v21 = vpack.c.bf16 %v1342_v19, %v1338_v18  ;;  %v1361_v43 = vld [vmem:[#allocation21 + $0x338] sm:$0xff]  ;;  %v1383_v18 = vld [vmem:[#allocation21 + $0x3e8] sm:$0xff] }
 0x49c   : > { %2212 = vmatprep.subr.bf16.mxu1 %v2211_v50 }
 0x49e   : > { %2162 = vmatpush1.bf16.msra.mxu0 %v2161_v31  ;;  %v1350_v31 = vld [vmem:[#allocation21 + $0x2e0] sm:$0xff] }
 0x49f   : > { %2214 = vmatpush1.bf16.msra.mxu1 %v2213_v56  ;;  %2164 = vmatprep.subr.bf16.mxu0 %v2163_v35  ;;  %v2177_v35 = vpack.c.bf16 %v1350_v31, %v1346_v30 }
 0x4a0   : > { %2216 = vmatprep.subr.bf16.mxu1 %v2215_v60  ;;  %v1331_v60 = vld [vmem:[#allocation21 + $0x248] sm:$0xff] }
 0x4a1   : > { %v2167_v63 = vpack.c.bf16 %v1335_v61, %v1331_v60 }
 0x4a2   : > { %2166 = vmatpush1.bf16.msra.mxu0 %v2165_v41  ;;  %v1357_v41 = vld [vmem:[#allocation21 + $0x318] sm:$0xff] }
 0x4a3   : > { %2218 = vmatpush1.bf16.msra.mxu1 %v2217_v4  ;;  %v2231_v4 = vpack.c.bf16 %v1337_v0, %v1333_v62  ;;  %2168 = vmatprep.subr.bf16.mxu0 %v2167_v63  ;;  %v1364_v62 = vld [vmem:[#allocation21 + $0x350] sm:$0xff]  ;;  %v1371_v0 = vld [vmem:[#allocation21 + $0x388] sm:$0xff] }
 0x4a4   : > { %2220 = vmatprep.subr.bf16.mxu1 %v2219_v11  ;;  %v1339_v11 = vld [vmem:[#allocation21 + $0x288] sm:$0xff]  ;;  %v1368_v63 = vld [vmem:[#allocation21 + $0x370] sm:$0xff]  ;;  %v2187_v6 = vpack.c.bf16 %v1375_v3, %v1371_v0 }
 0x4a5   : > { %v2171_v16 = vpack.c.bf16 %v1343_v13, %v1339_v11  ;;  %v2249_v1 = vpack.c.bf16 %v1368_v63, %v1364_v62  ;;  %v1374_v11 = vld [vmem:[#allocation21 + $0x3a0] sm:$0xff]  ;;  %v1372_v13 = vld [vmem:[#allocation21 + $0x390] sm:$0xff] }
 0x4a6   : > { %2170 = vmatpush1.bf16.msra.mxu0 %v2169_v5  ;;  %v1377_v5 = vld [vmem:[#allocation21 + $0x3b8] sm:$0xff] }
 0x4a7   : > { %2222 = vmatpush1.bf16.msra.mxu1 %v2221_v20  ;;  %v2235_v20 = vpack.c.bf16 %v1345_v17, %v1341_v14  ;;  %2172 = vmatprep.subr.bf16.mxu0 %v2171_v16  ;;  %v1376_v16 = vld [vmem:[#allocation21 + $0x3b0] sm:$0xff]  ;;  %v1379_v17 = vld [vmem:[#allocation21 + $0x3c8] sm:$0xff] }
 0x4a8   : > { %2224 = vmatprep.subr.bf16.mxu1 %v2223_v25  ;;  %v1347_v25 = vld [vmem:[#allocation21 + $0x2c8] sm:$0xff]  ;;  %v2253_v19 = vpack.c.bf16 %v1376_v16, %v1372_v13 }
 0x4a9   : > { %v2175_v28 = vpack.c.bf16 %v1351_v26, %v1347_v25  ;;  %v1382_v25 = vld [vmem:[#allocation21 + $0x3e0] sm:$0xff]  ;;  %v1380_v26 = vld [vmem:[#allocation21 + $0x3d0] sm:$0xff] }
 0x4aa   : > { %2174 = vmatpush1.bf16.msra.mxu0 %v2173_v21  ;;  %v1381_v21 = vld [vmem:[#allocation21 + $0x3d8] sm:$0xff] }
 0x4ab   : > { %2226 = vmatpush1.bf16.msra.mxu1 %v2225_v32  ;;  %v2239_v32 = vpack.c.bf16 %v1353_v29, %v1349_v27  ;;  %2176 = vmatprep.subr.bf16.mxu0 %v2175_v28  ;;  %v1384_v27 = vld [vmem:[#allocation21 + $0x3f0] sm:$0xff]  ;;  %v2193_v28 = vpack.c.bf16 %v1382_v25, %v1378_v23 }
 0x4ac   : > { %2228 = vmatprep.subr.bf16.mxu1 %v2227_v38  ;;  %v2241_v38 = vpack.c.bf16 %v1352_v37, %v1348_v36  ;;  %v2257_v29 = vpack.c.bf16 %v1384_v27, %v1380_v26 }
 0x4ae   : > { %2178 = vmatpush1.bf16.msra.mxu0 %v2177_v35 }
 0x4af   : > { %2230 = vmatpush1.bf16.msra.mxu1 %v2229_v42  ;;  %v2179_v42 = vpack.c.bf16 %v1359_v40, %v1355_v39 }
 0x4b0   : > { %2232 = vmatprep.subr.bf16.mxu1 %v2231_v4  ;;  %v1373_v4 = vld [vmem:[#allocation21 + $0x398] sm:$0xff] }
 0x4b1   : > { %2180 = vmatprep.subr.bf16.mxu0 %v2179_v42  ;;  %v2251_v7 = vpack.c.bf16 %v1377_v5, %v1373_v4 }
 0x4b3   : > { %2234 = vmatpush1.bf16.msra.mxu1 %v2233_v10  ;;  %v1370_v10 = vld [vmem:[#allocation21 + $0x380] sm:$0xff] }
 0x4b4   : > { %2236 = vmatprep.subr.bf16.mxu1 %v2235_v20  ;;  %v2189_v14 = vpack.c.bf16 %v1374_v11, %v1370_v10  ;;  %v2191_v20 = vpack.c.bf16 %v1383_v18, %v1379_v17  ;;  %v3586_v17 = vsub.s32 3, %v3522_v8 }
 0x4b7   : > { %2238 = vmatpush1.bf16.msra.mxu1 %v2237_v24  ;;  %v2255_v24 = vpack.c.bf16 %v1385_v22, %v1381_v21 }
 0x4b8   : > { %2240 = vmatprep.subr.bf16.mxu1 %v2239_v32 }
 0x4bb   : > { %2242 = vmatpush1.bf16.msra.mxu1 %v2241_v38 }
 0x561   : > { %v1173_v46 = vpop.f32.mrb[0].mxu1 }
 0x562   : > { %v3556_v47 = vadd.f32 %v1173_v46, %v1100_v44  ;;  %v1175_v48 = vpop.f32.mrb[1].mxu1  ;;  %v2243_v46 = vpack.c.bf16 %v1361_v43, %v1357_v41 }
 0x563   : > { %v3558_v49 = vadd.f32 %v1175_v48, %v1104_v45 }
 0x564   : > { %v1192_v50 = vmul.f32 %v3556_v47, %v3556_v47  ;;  %2244 = vmatprep.subr.bf16.mxu1 %v2243_v46 }
 0x565   : > { %v1179_v51 = vpop.f32.mrb[2].mxu1  ;;  %v1186_v52 = vadd.f32 %v3558_v49, %v3556_v47  ;;  %v1193_v53 = vmul.f32 %v3558_v49, %v3558_v49 }
 0x566   : > { %v3566_v54 = vadd.f32 %v1179_v51, %v1100_v44  ;;  %v1181_v33 = vpop.f32.mrb[3].mxu1  ;;  %v1354_v44 = vld [vmem:[#allocation21 + $0x300] sm:$0xff]  ;;  %v1360_v51 = vld [vmem:[#allocation21 + $0x330] sm:$0xff] }
 0x567   : > { %v3568_v55 = vadd.f32 %v1181_v33, %v1104_v45  ;;  %1187 = vadd.xlane.f32.xlu1 %v1186_v52  ;;  %v1196_v56 = vadd.f32 %v1193_v53, %v1192_v50  ;;  %v1358_v45 = vld [vmem:[#allocation21 + $0x320] sm:$0xff]  ;;  %v1356_v50 = vld [vmem:[#allocation21 + $0x310] sm:$0xff]  ;;  %v1363_v53 = vld [vmem:[#allocation21 + $0x348] sm:$0xff] }
 0x568   : > { %v1194_v57 = vmul.f32 %v3566_v54, %v3566_v54  ;;  %v2181_v48 = vpack.c.bf16 %v1358_v45, %v1354_v44  ;;  %v2245_v52 = vpack.c.bf16 %v1360_v51, %v1356_v50  ;;  %v1367_v33 = vld [vmem:[#allocation21 + $0x368] sm:$0xff]  ;;  %v1184_v50 = vld [vmem:[#allocation18] sm:$0x3]  ;;  %v1185_v51 = vld [vmem:[#allocation19] sm:$0x3] }
 0x569   : > { %1197 = vadd.xlane.f32.xlu0 %v1196_v56  ;;  %v1189_v58 = vadd.f32 %v3568_v55, %v3566_v54  ;;  %v1195_v59 = vmul.f32 %v3568_v55, %v3568_v55  ;;  %v1365_v56 = vld [vmem:[#allocation21 + $0x358] sm:$0xff] }
 0x56a   : > { %2182 = vmatpush1.bf16.msra.mxu0 %v2181_v48  ;;  %2246 = vmatpush1.bf16.msra.mxu1 %v2245_v52 }
 0x56b   : > { %1190 = vadd.xlane.f32.xlu1 %v1189_v58  ;;  %v1199_v34 = vadd.f32 %v1195_v59, %v1194_v57  ;;  %v2183_v57 = vpack.c.bf16 %v1367_v33, %v1363_v53  ;;  %v1369_v58 = vld [vmem:[#allocation21 + $0x378] sm:$0xff]  ;;  %v1362_v59 = vld [vmem:[#allocation21 + $0x340] sm:$0xff]  ;;  %v1228_v33 = vrot.slane %v1184_v50, %v3528_v12 }
 0x56c   : > { %v2247_v60 = vpack.c.bf16 %v1369_v58, %v1365_v56  ;;  %v1232_v56 = vrot.slane %v1184_v50, %v3525_v9 }
 0x56d   : > { %1200 = vadd.xlane.f32.xlu0 %v1199_v34  ;;  %v1366_v34 = vld [vmem:[#allocation21 + $0x360] sm:$0xff]  ;;  %2184 = vmatprep.subr.bf16.mxu0 %v2183_v57 }
 0x56e   : > { %v2185_v61 = vpack.c.bf16 %v1366_v34, %v1362_v59  ;;  %2248 = vmatprep.subr.bf16.mxu1 %v2247_v60  ;;  %v1243_v59 = vrot.slane %v1185_v51, %v3528_v12  ;;  %v1247_v34 = vrot.slane %v1185_v51, %v3525_v9 }
 0x56f   : > { %2250 = vmatpush1.bf16.msra.mxu1 %v2249_v1 }
 0x570   : > { %2186 = vmatpush1.bf16.msra.mxu0 %v2185_v61  ;;  %2252 = vmatprep.subr.bf16.mxu1 %v2251_v7 }
 0x571   : > { %2188 = vmatprep.subr.bf16.mxu0 %v2187_v6 }
 0x573   : > { %2254 = vmatpush1.bf16.msra.mxu1 %v2253_v19 }
 0x574   : > { %2190 = vmatpush1.bf16.msra.mxu0 %v2189_v14  ;;  %2256 = vmatprep.subr.bf16.mxu1 %v2255_v24 }
 0x575   : > { %2192 = vmatprep.subr.bf16.mxu0 %v2191_v20 }
 0x577   : > { %2258 = vmatpush1.bf16.msra.mxu1 %v2257_v29 }
 0x578   : > { %2194 = vmatpush1.bf16.msra.mxu0 %v2193_v28 }
 0x5f4   : > { %v1188_v30 = vpop.xlane.xlu1 %1187 }
 0x5f5   : > { %v1202_v31 = vmul.f32 0.00390625, %v1188_v30 }
 0x5f6   : > { %v1198_v32 = vpop.xlane.xlu0 %1197 }
 0x5f7   : > { %v1206_v35 = vmul.f32 %v1202_v31, %v1202_v31  ;;  %v1204_v36 = vmul.f32 0.00390625, %v1198_v32  ;;  %v1216_v52 = vsub.f32 %v3556_v47, %v1202_v31  ;;  %v1217_v53 = vsub.f32 %v3558_v49, %v1202_v31 }
 0x5f8   : > { %v1191_v37 = vpop.xlane.xlu1 %1190 }
 0x5f9   : > { %v1208_v38 = vsub.f32 %v1204_v36, %v1206_v35  ;;  %v1203_v39 = vmul.f32 0.00390625, %v1191_v37 }
 0x5fa   : > { %v1201_v40 = vpop.xlane.xlu0 %1200 }
 0x5fb   : > { %v1210_v41 = vmax.f32 %v1208_v38, 0.0  ;;  %v1207_v42 = vmul.f32 %v1203_v39, %v1203_v39  ;;  %v1205_v43 = vmul.f32 0.00390625, %v1201_v40  ;;  %v1218_v63 = vsub.f32 %v3566_v54, %v1203_v39  ;;  %v1386_v54 = vld [vmem:[#allocation22] sm:$0xf] }
 0x5fc   : > { %v1219_v0 = vsub.f32 %v3568_v55, %v1203_v39  ;;  %v1391_v55 = vrot.slane %v1386_v54, %v3528_v12  ;;  %v1399_v18 = vrot.slane %v1386_v54, %v3532_v15  ;;  %v1395_v19 = vrot.slane %v1386_v54, %v3525_v9 }
 0x5fd   : > { %v1212_v44 = vadd.f32 1e-05, %v1210_v41  ;;  %v1209_v45 = vsub.f32 %v1205_v43, %v1207_v42  ;;  %v1403_v24 = vrot.slane %v1386_v54, %v3586_v17 }
 0x5ff   : > { %2470 = vrsqrt.f32 %v1212_v44  ;;  %v1211_v46 = vmax.f32 %v1209_v45, 0.0 }
 0x601   : > { %v1213_v48 = vadd.f32 1e-05, %v1211_v46 }
 0x603   : > { %2472 = vrsqrt.f32 %v1213_v48 }
 0x609   : > { %v2471_v57 = vpop.eup %2470 }
 0x60a   : > { %v1221_v58 = vmul.f32 %v2471_v57, %v1217_v53  ;;  %v1220_v60 = vmul.f32 %v2471_v57, %v1216_v52 }
 0x60c   : > { %v1236_v61 = vmul.f32 %v1232_v56, %v1221_v58  ;;  %v1235_v62 = vmul.f32 %v1228_v33, %v1220_v60 }
 0x60d   : > { %v2473_v47 = vpop.eup %2472 }
 0x60e   : > { %v1251_v1 = vadd.f32 %v1247_v34, %v1236_v61  ;;  %v1250_v49 = vadd.f32 %v1243_v59, %v1235_v62  ;;  %v1223_v3 = vmul.f32 %v2473_v47, %v1219_v0  ;;  %v1222_v4 = vmul.f32 %v2473_v47, %v1218_v63 }
 0x610   : > { %v1255_v5 = vmax.f32 %v1251_v1, 0.0  ;;  %v1254_v6 = vmax.f32 %v1250_v49, 0.0  ;;  %v1238_v7 = vmul.f32 %v1232_v56, %v1223_v3  ;;  %v1237_v10 = vmul.f32 %v1228_v33, %v1222_v4 }
 0x612   : > { %1472 = vmatprep.mubr.f32.mxu0 %v1255_v5  ;;  %1549 = vmatprep.mubr.f32.mxu1 %v1255_v5  ;;  %v1253_v11 = vadd.f32 %v1247_v34, %v1238_v7  ;;  %v1252_v13 = vadd.f32 %v1243_v59, %v1237_v10 }
 0x613   : > { %1473 = vmatmul.mubr.f32.vlgmr.msra.gmra.mrb[2].mxu0 %v1254_v6  ;;  %1550 = vmatmul.mubr.f32.vlgmr.msra.gmra.mrb[4].mxu1 %v1254_v6 }
 0x614   : > { %v1257_v14 = vmax.f32 %v1253_v11, 0.0  ;;  %v1256_v16 = vmax.f32 %v1252_v13, 0.0 }
 0x616   : > { %1478 = vmatprep.mubr.f32.mxu0 %v1257_v14  ;;  %1555 = vmatprep.mubr.f32.mxu1 %v1257_v14 }
 0x617   : > { %1479 = vmatmul.mubr.f32.gmra.mrb[4].mxu0 %v1256_v16  ;;  %1556 = vmatmul.mubr.f32.gmra.mrb[6].mxu1 %v1256_v16  ;;  %v1562_v16 = vld [vmem:[#allocation24] sm:$0xf] }
 0x618   : > { %v1626_v54 = vrot.slane %v1562_v16, %v3528_v12 }
 0x6e6   : > { %v1474_v20 = vpop.f32.mrb[2].mxu0  ;;  %v1551_v21 = vpop.f32.mrb[4].mxu1 }
 0x6e7   : > { %v3590_v22 = vadd.f32 %v1474_v20, %v1391_v55  ;;  %v1476_v23 = vpop.f32.mrb[3].mxu0  ;;  %v1553_v25 = vpop.f32.mrb[5].mxu1  ;;  %v3593_v26 = vadd.f32 %v1551_v21, %v1399_v18  ;;  %v1563_v20 = vld [vmem:[#allocation25] sm:$0xf] }
 0x6e8   : > { %v3595_v27 = vadd.f32 %v1476_v23, %v1395_v19  ;;  %v3603_v31 = vadd.f32 %v1553_v25, %v1403_v24 }
 0x6e9   : > { %v1574_v28 = vmul.f32 %v3590_v22, %v3590_v22  ;;  %v1576_v36 = vmul.f32 %v3593_v26, %v3593_v26 }
 0x6ea   : > { %v1564_v29 = vadd.f32 %v3595_v27, %v3590_v22  ;;  %v1575_v30 = vmul.f32 %v3595_v27, %v3595_v27  ;;  %v1480_v32 = vpop.f32.mrb[4].mxu0  ;;  %v1557_v35 = vpop.f32.mrb[6].mxu1  ;;  %v1577_v51 = vmul.f32 %v3603_v31, %v3603_v31 }
 0x6eb   : > { %v3607_v37 = vadd.f32 %v1480_v32, %v1391_v55  ;;  %v1482_v38 = vpop.f32.mrb[5].mxu0  ;;  %v1559_v39 = vpop.f32.mrb[7].mxu1  ;;  %v3610_v42 = vadd.f32 %v1557_v35, %v1399_v18  ;;  %v1630_v55 = vrot.slane %v1562_v16, %v3525_v9  ;;  %v1634_v18 = vrot.slane %v1562_v16, %v3532_v15 }
 0x6ec   : > { %v1565_v40 = vadd.f32 %v1564_v29, %v3593_v26  ;;  %v1582_v41 = vadd.f32 %v1575_v30, %v1574_v28  ;;  %v3612_v43 = vadd.f32 %v1482_v38, %v1395_v19  ;;  %v1560_v53 = vadd.f32 %v1559_v39, %v1403_v24 }
 0x6ed   : > { %v1578_v44 = vmul.f32 %v3607_v37, %v3607_v37  ;;  %v1580_v52 = vmul.f32 %v3610_v42, %v3610_v42  ;;  %v1638_v19 = vrot.slane %v1562_v16, %v3586_v17  ;;  %v1659_v38 = vrot.slane %v1563_v20, %v3525_v9 }
 0x6ee   : > { %v1566_v45 = vadd.f32 %v1565_v40, %v3603_v31  ;;  %v1583_v46 = vadd.f32 %v1582_v41, %v1576_v36  ;;  %v1569_v48 = vadd.f32 %v3612_v43, %v3607_v37  ;;  %v1579_v50 = vmul.f32 %v3612_v43, %v3612_v43 }
 0x6ef   : > { %v1581_v34 = vmul.f32 %v1560_v53, %v1560_v53  ;;  %v1655_v36 = vrot.slane %v1563_v20, %v3528_v12  ;;  %v1663_v39 = vrot.slane %v1563_v20, %v3532_v15  ;;  %v1667_v40 = vrot.slane %v1563_v20, %v3586_v17 }
 0x6f0   : > { %1567 = vadd.xlane.f32.xlu1 %v1566_v45  ;;  %v1570_v33 = vadd.f32 %v1569_v48, %v3610_v42  ;;  %v1587_v56 = vadd.f32 %v1579_v50, %v1578_v44  ;;  %v1584_v57 = vadd.f32 %v1583_v46, %v1577_v51 }
 0x6f2   : > { %v1571_v58 = vadd.f32 %v1570_v33, %v1560_v53  ;;  %v1588_v59 = vadd.f32 %v1587_v56, %v1580_v52 }
 0x6f4   : > { %1585 = vadd.xlane.f32.xlu1 %v1584_v57  ;;  %1572 = vadd.xlane.f32.xlu0 %v1571_v58  ;;  %v1589_v60 = vadd.f32 %v1588_v59, %v1581_v34 }
 0x6f8   : > { %1590 = vadd.xlane.f32.xlu0 %v1589_v60 }
 0x77d   : > { %v1568_v61 = vpop.xlane.xlu1 %1567 }
 0x77e   : > { %v1592_v62 = vmul.f32 0.001953125, %v1568_v61 }
 0x780   : > { %v1596_v0 = vmul.f32 %v1592_v62, %v1592_v62  ;;  %v1606_v21 = vsub.f32 %v3590_v22, %v1592_v62  ;;  %v1607_v23 = vsub.f32 %v3595_v27, %v1592_v62  ;;  %v1608_v24 = vsub.f32 %v3593_v26, %v1592_v62 }
 0x781   : > { %v1586_v63 = vpop.xlane.xlu1 %1585  ;;  %v1573_v1 = vpop.xlane.xlu0 %1572  ;;  %v1609_v25 = vsub.f32 %v3603_v31, %v1592_v62 }
 0x782   : > { %v1594_v47 = vmul.f32 0.001953125, %v1586_v63  ;;  %v1593_v49 = vmul.f32 0.001953125, %v1573_v1 }
 0x784   : > { %v1598_v3 = vsub.f32 %v1594_v47, %v1596_v0  ;;  %v1597_v6 = vmul.f32 %v1593_v49, %v1593_v49  ;;  %v1610_v26 = vsub.f32 %v3607_v37, %v1593_v49  ;;  %v1611_v31 = vsub.f32 %v3612_v43, %v1593_v49 }
 0x785   : > { %v1591_v5 = vpop.xlane.xlu0 %1590  ;;  %v1612_v45 = vsub.f32 %v3610_v42, %v1593_v49  ;;  %v1613_v46 = vsub.f32 %v1560_v53, %v1593_v49 }
 0x786   : > { %v1600_v4 = vmax.f32 %v1598_v3, 0.0  ;;  %v1595_v7 = vmul.f32 0.001953125, %v1591_v5 }
 0x788   : > { %v1602_v10 = vadd.f32 1e-05, %v1600_v4  ;;  %v1599_v11 = vsub.f32 %v1595_v7, %v1597_v6 }
 0x78a   : > { %2474 = vrsqrt.f32 %v1602_v10  ;;  %v1601_v13 = vmax.f32 %v1599_v11, 0.0 }
 0x78c   : > { %v1603_v14 = vadd.f32 1e-05, %v1601_v13  ;;  %v3013_v13 = vmov 1966171168  }
 0x78e   : > { %2476 = vrsqrt.f32 %v1603_v14  ;;  %v1733_v14 = vunpack.c.l.s4 %v3013_v13 }
 0x794   : > { %v2475_v28 = vpop.eup %2474 }
 0x795   : > { %v1614_v29 = vmul.f32 %v2475_v28, %v1606_v21  ;;  %v1615_v30 = vmul.f32 %v2475_v28, %v1607_v23  ;;  %v1616_v32 = vmul.f32 %v2475_v28, %v1608_v24  ;;  %v1617_v35 = vmul.f32 %v2475_v28, %v1609_v25 }
 0x796   : > { %v1734_v24 = vunpack.c.0.s8 %v1733_v14 }
 0x797   : > { %v1643_v22 = vmul.f32 %v1626_v54, %v1614_v29  ;;  %v1644_v41 = vmul.f32 %v1630_v55, %v1615_v30  ;;  %v1645_v27 = vmul.f32 %v1634_v18, %v1616_v32  ;;  %v1646_v44 = vmul.f32 %v1638_v19, %v1617_v35 }
 0x798   : > { %v2477_v48 = vpop.eup %2476 }
 0x799   : > { %v1618_v50 = vmul.f32 %v2477_v48, %v1610_v26  ;;  %v1619_v12 = vmul.f32 %v2477_v48, %v1611_v31  ;;  %v1620_v51 = vmul.f32 %v2477_v48, %v1612_v45  ;;  %v1621_v9 = vmul.f32 %v2477_v48, %v1613_v46  ;;  %v1725_v48 = vld [vmem:[%s3517_s19] sm:$0xf] }
 0x79a   : > { %v1672_v52 = vadd.f32 %v1655_v36, %v1643_v22  ;;  %v1673_v15 = vadd.f32 %v1659_v38, %v1644_v41  ;;  %v1674_v33 = vadd.f32 %v1663_v39, %v1645_v27  ;;  %v1675_v17 = vadd.f32 %v1667_v40, %v1646_v44 }
 0x79b   : > { %v1647_v56 = vmul.f32 %v1626_v54, %v1618_v50  ;;  %v1648_v57 = vmul.f32 %v1630_v55, %v1619_v12  ;;  %v1649_v58 = vmul.f32 %v1634_v18, %v1620_v51  ;;  %v1650_v59 = vmul.f32 %v1638_v19, %v1621_v9 }
 0x79c   : > { %v1680_v61 = vmax.f32 %v1672_v52, 0.0  ;;  %v1681_v42 = vmax.f32 %v1673_v15, 0.0  ;;  %v1682_v53 = vmax.f32 %v1674_v33, 0.0  ;;  %v1683_v62 = vmax.f32 %v1675_v17, 0.0 }
 0x79d   : > { %v1676_v34 = vadd.f32 %v1655_v36, %v1647_v56  ;;  %v1677_v37 = vadd.f32 %v1659_v38, %v1648_v57  ;;  %v1678_v60 = vadd.f32 %v1663_v39, %v1649_v58  ;;  %v1679_v43 = vadd.f32 %v1667_v40, %v1650_v59 }
 0x79e   : > { %v1737_v39 = vsub.s32 %v1734_v24, %v3522_v8 }
 0x79f   : > { %v1684_v63 = vmax.f32 %v1676_v34, 0.0  ;;  %v1685_v0 = vmax.f32 %v1677_v37, 0.0  ;;  %v1686_v47 = vmax.f32 %v1678_v60, 0.0  ;;  %v1687_v1 = vmax.f32 %v1679_v43, 0.0 }
 0x7a1   : > { %v1688_v49 = vmax.f32 %v1680_v61, %v1684_v63  ;;  %v1695_v3 = vmax.f32 %v1681_v42, %v1685_v0  ;;  %v1702_v4 = vmax.f32 %v1682_v53, %v1686_v47  ;;  %v1709_v5 = vmax.f32 %v1683_v62, %v1687_v1 }
 0x7a3   : > { %v1689_v6 = vrot.slane %v1688_v49, 4  ;;  %v1696_v7 = vrot.slane %v1695_v3, 4  ;;  %v1703_v10 = vrot.slane %v1702_v4, 4  ;;  %v1710_v11 = vrot.slane %v1709_v5, 4 }
 0x7a5   : > { %v1690_v16 = vmax.f32 %v1688_v49, %v1689_v6  ;;  %v1697_v54 = vmax.f32 %v1695_v3, %v1696_v7  ;;  %v1704_v55 = vmax.f32 %v1702_v4, %v1703_v10  ;;  %v1711_v18 = vmax.f32 %v1709_v5, %v1710_v11 }
 0x7a7   : > { %v1691_v19 = vrot.slane %v1690_v16, 2  ;;  %v1698_v20 = vrot.slane %v1697_v54, 2  ;;  %v1705_v21 = vrot.slane %v1704_v55, 2  ;;  %v1712_v23 = vrot.slane %v1711_v18, 2 }
 0x7a9   : > { %v1692_v25 = vmax.f32 %v1690_v16, %v1691_v19  ;;  %v1699_v28 = vmax.f32 %v1697_v54, %v1698_v20  ;;  %v1706_v29 = vmax.f32 %v1704_v55, %v1705_v21  ;;  %v1713_v30 = vmax.f32 %v1711_v18, %v1712_v23 }
 0x7ab   : > { %v1693_v32 = vrot.slane %v1692_v25, 1  ;;  %v1700_v35 = vrot.slane %v1699_v28, 1  ;;  %v1707_v36 = vrot.slane %v1706_v29, 1  ;;  %v1714_v38 = vrot.slane %v1713_v30, 1 }
 0x7ad   : > { %v1694_v40 = vmax.f32 %v1692_v25, %v1693_v32  ;;  %v1701_v22 = vmax.f32 %v1699_v28, %v1700_v35  ;;  %v1708_v41 = vmax.f32 %v1706_v29, %v1707_v36  ;;  %v1715_v27 = vmax.f32 %v1713_v30, %v1714_v38 }
 0x7af   : > { %v1730_v44 = vcombine.low %v1694_v40, %v1701_v22  ;;  %v1731_v26 = vcombine.low %v1708_v41, %v1715_v27 }
 0x7b1   : > { %v1738_v31 = vrot.slane %v1730_v44, %v1737_v39  ;;  %v1745_v45 = vrot.slane %v1731_v26, %v1737_v39 }
 0x7b3   : > { %v1746_v46 = vcombine.low %v1738_v31, %v1745_v45 }
 0x7b5   : > { %v1753_v50 = vrot.slane %v1746_v46, %v1737_v39 }
 0x7b7   : > { %v1755_v12 = vmax.f32 %v1725_v48, %v1753_v50 }
 0x7b9   : > { %1760 = vst.msk [vmem:[%s3517_s19] sm:$0xf] %vm3507_vm0, %v1755_v12 }
 0x7ba PF: > { %s3714_s26 = sld [smem:[#allocation37_spill]]  ;;  %s3715_s24 = smov %s2980_s25 }
 0x7bb   : > { %s3716_s25 = smov %s3718_s23 }
 0x7c0   : > { %s36_s26 = sadd.s32 1, %s3714_s26  }
 0x7c1   : > { %p33_p7 = scmp.ge.s32.totalorder %s36_s26, 4  }
 0x7c3   :  { %35 = sbr.rel (!%p33_p7) target bundleno = 19 (0x13), region = 187 }
 0x7ca   :  { %1788 = vsyncpa [#allocation3], 1 }
 0x7cb   :  { %1790 = vsyncpa [#allocation3 + $0x1], 1 }
 0x7cc   :  { %1791 = vsyncpa [#allocation5], 1 }
 0x7cd   :  { %1792 = vsyncpa [#allocation8], 1 }
 0x7ce   :  { %1793 = vsyncpa [#allocation11], 1 }
 0x7cf   :  { %1794 = vsyncpa [#allocation14], 1 }
 0x7d0   :  { %1795 = vsyncpa [#allocation17], 1 }
 0x7d1   :  { %1796 = vsyncpa [#allocation20], 1 }
 0x7d2   :  { %1797 = vsyncpa [#allocation23], 1 }
 0x7d3   :  { %1798 = vsyncpa [#allocation26], 1 }

</bundles_post_ra>
